<compile_context>
chip_gen: v7x
topology: tpu7x:2x2x1
jax: 0.10.0
libtpu: 0.0.40
codegen_flags: <defaults>
</compile_context>

<pallas_src>
import functools
import math

import jax
import jax.numpy as jnp
from jax.experimental import pallas as pl
from jax.experimental.pallas import tpu as pltpu


# ------------------------------ Pallas kernel -------------------------------


def _gsa_kernel(x_ref, w_ref, o_ref, *, batch, heads_per_group, head_dim):
    """Fused GlobalSparseAttention, channel-major layout, one grid step per head group.

    x_ref : (B, C, N)            downsampled tokens, NCHW-native (channel-major)
    w_ref : (1, hpg*3*d, C)      this group's rows of the qkv 1x1-conv weight
    o_ref : (B, hpg*d, N)        this group's output channels
    """
    d = head_dim
    w = w_ref[0]                                                    # (hpg*3d, C)

    for b in range(batch):                      # static unroll; all batches in one step
        x = x_ref[b]                                                # (C, N)

        # qkv 1x1 conv for this head group: one MXU matmul, (hpg*3d, C) @ (C, N).
        qkv = jnp.dot(w, x, preferred_element_type=jnp.float32)     # (hpg*3d, N)

        for h in range(heads_per_group):        # static unroll over heads in this group
            base = h * 3 * d
            q = qkv[base:base + d]                                  # (d, N) sublane slice
            k = qkv[base + d:base + 2 * d]                          # (d, N)
            v = qkv[base + 2 * d:base + 3 * d]                      # (d, N)

            # Key-major scores: s_t[j, i] = sum_c k[c, j] * q[c, i]
            # (reference never applies self.scale -> no scaling).
            s_t = jax.lax.dot_general(k, q, (((0,), (0,)), ((), ())),
                                      preferred_element_type=jnp.float32)   # (N, N)
            s_t = s_t - jnp.max(s_t, axis=0, keepdims=True)         # per-query max
            e = jnp.exp(s_t)
            denom = jnp.sum(e, axis=0, keepdims=True)               # (1, N)

            # out_h[c, i] = sum_j v[c, j] * softmax_j(s)[i, j]; normalization folded
            # into a (d, N) scale after the PV matmul (broadcasts over sublanes).
            o_h = jnp.dot(v, e, preferred_element_type=jnp.float32) / denom  # (d, N)

            # Direct per-head store into this group's output rows (no concat).
            o_ref[b, h * d:(h + 1) * d, :] = o_h.astype(o_ref.dtype)


# --------------------------------- wrapper ----------------------------------


def _default_head_groups(heads):
    """2 parallel head groups on 2-TC chips (v7x), 1 otherwise (v5e/v6e)."""
    try:
        kind = jax.devices()[0].device_kind.lower()
    except Exception:
        return 1
    groups = 2 if "v7" in kind else 1
    return groups if (groups <= heads and heads % groups == 0) else 1


def global_sparse_attention(x_nchw, w_conv, *, r, heads, head_groups=None):
    """x_nchw: (B, C, H, W) float32; w_conv: (3C, C) Conv2d(C,3C,1,bias=False) weight.

    Returns (B, C, ceil(H/r), ceil(W/r)) matching the PyTorch module.
    """
    B, C, H, W = x_nchw.shape
    assert C % heads == 0
    d = C // heads
    if head_groups is None:
        head_groups = _default_head_groups(heads)
    hpg = heads // head_groups

    # AvgPool2d(kernel_size=1, stride=r) == strided subsample; the reshape to (B, C, N)
    # is a free contiguous view of the sliced array (no transpose anywhere).
    xs = x_nchw[:, :, ::r, ::r]
    Hs, Ws = xs.shape[2], xs.shape[3]
    N = Hs * Ws
    x_cn = xs.reshape(B, C, N)

    # Weight rows are already grouped per head as [q(d); k(d); v(d)] in PyTorch order,
    # so splitting into head groups is a free row regroup (no permutation).
    w_blk = w_conv.reshape(head_groups, hpg * 3 * d, C)

    kernel = functools.partial(_gsa_kernel, batch=B, heads_per_group=hpg, head_dim=d)
    out = pl.pallas_call(
        kernel,
        out_shape=jax.ShapeDtypeStruct((B, C, N), jnp.float32),
        grid=(head_groups,),
        in_specs=[
            pl.BlockSpec((B, C, N), lambda g: (0, 0, 0)),            # all tokens, once
            pl.BlockSpec((1, hpg * 3 * d, C), lambda g: (g, 0, 0)),  # this group's weight
        ],
        out_specs=pl.BlockSpec((B, hpg * d, N), lambda g: (0, g, 0)),
        compiler_params=pltpu.CompilerParams(
            dimension_semantics=("parallel",)),     # v7x: head groups across 2 TCs
    )(x_cn, w_blk)

    # (B, C, N) -> (B, C, Hs, Ws): free contiguous reshape, no transpose.
    return out.reshape(B, C, Hs, Ws)


# ----------------------------------- main ------------------------------------


if __name__ == "__main__":
    B, C, H, W = 2, 32, 16, 16          # PyTorch input NCHW = (2, 32, 16, 16)
    r, heads = 2, 4

    key = jax.random.PRNGKey(0)
    kx, kw = jax.random.split(key)
    x = jax.random.normal(kx, (B, C, H, W), jnp.float32)
    # PyTorch Conv2d(C, 3C, 1, bias=False).weight has shape (3C, C, 1, 1); we use the
    # squeezed (3C, C) matrix with the same output-channel (row) ordering.
    w_conv = (1.0 / math.sqrt(C)) * jax.random.normal(kw, (3 * C, C), jnp.float32)

    fwd = jax.jit(functools.partial(global_sparse_attention, r=r, heads=heads))
    out = jax.block_until_ready(fwd(x, w_conv))

    assert out.shape == (B, C, H // r, W // r), out.shape
    assert bool(jnp.all(jnp.isfinite(out)))
    print("KERNEL_OK")
</pallas_src>

<mosaic_0001>
module attributes {stable_mosaic.version = 11 : i64} {
  func.func @_gsa_kernel(%arg0: i32, %arg1: memref<2x32x64xf32, #tpu.memory_space<vmem>>, %arg2: memref<1x96x32xf32, #tpu.memory_space<vmem>>, %arg3: memref<2x32x64xf32, #tpu.memory_space<vmem>>) attributes {dimension_semantics = [#tpu.dimension_semantics<parallel>], iteration_bounds = array<i64: 1>, scalar_prefetch = 0 : i64, scratch_operands = 0 : i64, tpu.core_type = #tpu.core_type<tc>, window_params = [{pipeline_mode = #tpu.pipeline_mode<synchronous>, transform_indices = @transform_0, window_bounds = array<i64: 2, 32, 64>}, {transform_indices = @transform_1, window_bounds = array<i64: 1, 96, 32>}, {transform_indices = @transform_2, window_bounds = array<i64: 2, 32, 64>}]} {
    %c0 = arith.constant 0 : index
    %c0_0 = arith.constant 0 : index
    %c0_1 = arith.constant 0 : index
    %0 = vector.load %arg2[%c0, %c0_0, %c0_1] : memref<1x96x32xf32, #tpu.memory_space<vmem>>, vector<1x96x32xf32>
    %1 = vector.shape_cast %0 : vector<1x96x32xf32> to vector<96x32xf32>
    %c0_2 = arith.constant 0 : index
    %c0_3 = arith.constant 0 : index
    %c0_4 = arith.constant 0 : index
    %2 = vector.load %arg1[%c0_2, %c0_3, %c0_4] : memref<2x32x64xf32, #tpu.memory_space<vmem>>, vector<1x32x64xf32>
    %3 = vector.shape_cast %2 : vector<1x32x64xf32> to vector<32x64xf32>
    %cst = arith.constant dense<0.000000e+00> : vector<96x64xf32>
    %4 = tpu.matmul %1, %3, %cst {dimension_numbers = #tpu.dot_dimension_numbers<[1], [0], [0], [1], [0, 0, 1, 1], [], []>} : vector<96x32xf32>, vector<32x64xf32>, vector<96x64xf32> -> vector<96x64xf32>
    %5 = vector.extract_strided_slice %4 {offsets = [0, 0], sizes = [8, 64], strides = [1, 1]} : vector<96x64xf32> to vector<8x64xf32>
    %6 = vector.extract_strided_slice %4 {offsets = [8, 0], sizes = [8, 64], strides = [1, 1]} : vector<96x64xf32> to vector<8x64xf32>
    %7 = vector.extract_strided_slice %4 {offsets = [16, 0], sizes = [8, 64], strides = [1, 1]} : vector<96x64xf32> to vector<8x64xf32>
    %cst_5 = arith.constant dense<0.000000e+00> : vector<64x64xf32>
    %8 = tpu.matmul %6, %5, %cst_5 {dimension_numbers = #tpu.dot_dimension_numbers<[0], [0], [1], [1], [0, 1, 1, 1], [], []>} : vector<8x64xf32>, vector<8x64xf32>, vector<64x64xf32> -> vector<64x64xf32>
    %cst_6 = arith.constant dense<0xFF800000> : vector<64xf32>
    %9 = vector.multi_reduction <maximumf>, %8, %cst_6 [0] : vector<64x64xf32> to vector<64xf32>
    %10 = vector.shape_cast %9 : vector<64xf32> to vector<1x64xf32>
    %11 = vector.broadcast %10 : vector<1x64xf32> to vector<64x64xf32>
    %12 = arith.subf %8, %11 : vector<64x64xf32>
    %13 = math.exp %12 : vector<64x64xf32>
    %cst_7 = arith.constant dense<0.000000e+00> : vector<64xf32>
    %14 = vector.multi_reduction <add>, %13, %cst_7 [0] : vector<64x64xf32> to vector<64xf32>
    %15 = vector.shape_cast %14 : vector<64xf32> to vector<1x64xf32>
    %cst_8 = arith.constant dense<0.000000e+00> : vector<8x64xf32>
    %16 = tpu.matmul %7, %13, %cst_8 {dimension_numbers = #tpu.dot_dimension_numbers<[1], [0], [0], [1], [0, 0, 1, 1], [], []>} : vector<8x64xf32>, vector<64x64xf32>, vector<8x64xf32> -> vector<8x64xf32>
    %17 = vector.broadcast %15 : vector<1x64xf32> to vector<8x64xf32>
    %18 = arith.divf %16, %17 : vector<8x64xf32>
    %c0_9 = arith.constant 0 : index
    %c0_10 = arith.constant 0 : index
    %c0_11 = arith.constant 0 : index
    %19 = vector.load %arg3[%c0_9, %c0_10, %c0_11] : memref<2x32x64xf32, #tpu.memory_space<vmem>>, vector<1x8x64xf32>
    %20 = vector.shape_cast %19 : vector<1x8x64xf32> to vector<8x64xf32>
    %21 = vector.shape_cast %18 : vector<8x64xf32> to vector<1x8x64xf32>
    tpu.vector_store %arg3[%c0_9, %c0_10, %c0_11], %21 {strides = array<i32>} : memref<2x32x64xf32, #tpu.memory_space<vmem>>, vector<1x8x64xf32>,
    %22 = vector.extract_strided_slice %4 {offsets = [24, 0], sizes = [8, 64], strides = [1, 1]} : vector<96x64xf32> to vector<8x64xf32>
    %23 = vector.extract_strided_slice %4 {offsets = [32, 0], sizes = [8, 64], strides = [1, 1]} : vector<96x64xf32> to vector<8x64xf32>
    %24 = vector.extract_strided_slice %4 {offsets = [40, 0], sizes = [8, 64], strides = [1, 1]} : vector<96x64xf32> to vector<8x64xf32>
    %cst_12 = arith.constant dense<0.000000e+00> : vector<64x64xf32>
    %25 = tpu.matmul %23, %22, %cst_12 {dimension_numbers = #tpu.dot_dimension_numbers<[0], [0], [1], [1], [0, 1, 1, 1], [], []>} : vector<8x64xf32>, vector<8x64xf32>, vector<64x64xf32> -> vector<64x64xf32>
    %cst_13 = arith.constant dense<0xFF800000> : vector<64xf32>
    %26 = vector.multi_reduction <maximumf>, %25, %cst_13 [0] : vector<64x64xf32> to vector<64xf32>
    %27 = vector.shape_cast %26 : vector<64xf32> to vector<1x64xf32>
    %28 = vector.broadcast %27 : vector<1x64xf32> to vector<64x64xf32>
    %29 = arith.subf %25, %28 : vector<64x64xf32>
    %30 = math.exp %29 : vector<64x64xf32>
    %cst_14 = arith.constant dense<0.000000e+00> : vector<64xf32>
    %31 = vector.multi_reduction <add>, %30, %cst_14 [0] : vector<64x64xf32> to vector<64xf32>
    %32 = vector.shape_cast %31 : vector<64xf32> to vector<1x64xf32>
    %cst_15 = arith.constant dense<0.000000e+00> : vector<8x64xf32>
    %33 = tpu.matmul %24, %30, %cst_15 {dimension_numbers = #tpu.dot_dimension_numbers<[1], [0], [0], [1], [0, 0, 1, 1], [], []>} : vector<8x64xf32>, vector<64x64xf32>, vector<8x64xf32> -> vector<8x64xf32>
    %34 = vector.broadcast %32 : vector<1x64xf32> to vector<8x64xf32>
    %35 = arith.divf %33, %34 : vector<8x64xf32>
    %c0_16 = arith.constant 0 : index
    %c8 = arith.constant 8 : index
    %c0_17 = arith.constant 0 : index
    %36 = vector.load %arg3[%c0_16, %c8, %c0_17] : memref<2x32x64xf32, #tpu.memory_space<vmem>>, vector<1x8x64xf32>
    %37 = vector.shape_cast %36 : vector<1x8x64xf32> to vector<8x64xf32>
    %38 = vector.shape_cast %35 : vector<8x64xf32> to vector<1x8x64xf32>
    tpu.vector_store %arg3[%c0_16, %c8, %c0_17], %38 {strides = array<i32>} : memref<2x32x64xf32, #tpu.memory_space<vmem>>, vector<1x8x64xf32>,
    %39 = vector.extract_strided_slice %4 {offsets = [48, 0], sizes = [8, 64], strides = [1, 1]} : vector<96x64xf32> to vector<8x64xf32>
    %40 = vector.extract_strided_slice %4 {offsets = [56, 0], sizes = [8, 64], strides = [1, 1]} : vector<96x64xf32> to vector<8x64xf32>
    %41 = vector.extract_strided_slice %4 {offsets = [64, 0], sizes = [8, 64], strides = [1, 1]} : vector<96x64xf32> to vector<8x64xf32>
    %cst_18 = arith.constant dense<0.000000e+00> : vector<64x64xf32>
    %42 = tpu.matmul %40, %39, %cst_18 {dimension_numbers = #tpu.dot_dimension_numbers<[0], [0], [1], [1], [0, 1, 1, 1], [], []>} : vector<8x64xf32>, vector<8x64xf32>, vector<64x64xf32> -> vector<64x64xf32>
    %cst_19 = arith.constant dense<0xFF800000> : vector<64xf32>
    %43 = vector.multi_reduction <maximumf>, %42, %cst_19 [0] : vector<64x64xf32> to vector<64xf32>
    %44 = vector.shape_cast %43 : vector<64xf32> to vector<1x64xf32>
    %45 = vector.broadcast %44 : vector<1x64xf32> to vector<64x64xf32>
    %46 = arith.subf %42, %45 : vector<64x64xf32>
    %47 = math.exp %46 : vector<64x64xf32>
    %cst_20 = arith.constant dense<0.000000e+00> : vector<64xf32>
    %48 = vector.multi_reduction <add>, %47, %cst_20 [0] : vector<64x64xf32> to vector<64xf32>
    %49 = vector.shape_cast %48 : vector<64xf32> to vector<1x64xf32>
    %cst_21 = arith.constant dense<0.000000e+00> : vector<8x64xf32>
    %50 = tpu.matmul %41, %47, %cst_21 {dimension_numbers = #tpu.dot_dimension_numbers<[1], [0], [0], [1], [0, 0, 1, 1], [], []>} : vector<8x64xf32>, vector<64x64xf32>, vector<8x64xf32> -> vector<8x64xf32>
    %51 = vector.broadcast %49 : vector<1x64xf32> to vector<8x64xf32>
    %52 = arith.divf %50, %51 : vector<8x64xf32>
    %c0_22 = arith.constant 0 : index
    %c16 = arith.constant 16 : index
    %c0_23 = arith.constant 0 : index
    %53 = vector.load %arg3[%c0_22, %c16, %c0_23] : memref<2x32x64xf32, #tpu.memory_space<vmem>>, vector<1x8x64xf32>
    %54 = vector.shape_cast %53 : vector<1x8x64xf32> to vector<8x64xf32>
    %55 = vector.shape_cast %52 : vector<8x64xf32> to vector<1x8x64xf32>
    tpu.vector_store %arg3[%c0_22, %c16, %c0_23], %55 {strides = array<i32>} : memref<2x32x64xf32, #tpu.memory_space<vmem>>, vector<1x8x64xf32>,
    %56 = vector.extract_strided_slice %4 {offsets = [72, 0], sizes = [8, 64], strides = [1, 1]} : vector<96x64xf32> to vector<8x64xf32>
    %57 = vector.extract_strided_slice %4 {offsets = [80, 0], sizes = [8, 64], strides = [1, 1]} : vector<96x64xf32> to vector<8x64xf32>
    %58 = vector.extract_strided_slice %4 {offsets = [88, 0], sizes = [8, 64], strides = [1, 1]} : vector<96x64xf32> to vector<8x64xf32>
    %cst_24 = arith.constant dense<0.000000e+00> : vector<64x64xf32>
    %59 = tpu.matmul %57, %56, %cst_24 {dimension_numbers = #tpu.dot_dimension_numbers<[0], [0], [1], [1], [0, 1, 1, 1], [], []>} : vector<8x64xf32>, vector<8x64xf32>, vector<64x64xf32> -> vector<64x64xf32>
    %cst_25 = arith.constant dense<0xFF800000> : vector<64xf32>
    %60 = vector.multi_reduction <maximumf>, %59, %cst_25 [0] : vector<64x64xf32> to vector<64xf32>
    %61 = vector.shape_cast %60 : vector<64xf32> to vector<1x64xf32>
    %62 = vector.broadcast %61 : vector<1x64xf32> to vector<64x64xf32>
    %63 = arith.subf %59, %62 : vector<64x64xf32>
    %64 = math.exp %63 : vector<64x64xf32>
    %cst_26 = arith.constant dense<0.000000e+00> : vector<64xf32>
    %65 = vector.multi_reduction <add>, %64, %cst_26 [0] : vector<64x64xf32> to vector<64xf32>
    %66 = vector.shape_cast %65 : vector<64xf32> to vector<1x64xf32>
    %cst_27 = arith.constant dense<0.000000e+00> : vector<8x64xf32>
    %67 = tpu.matmul %58, %64, %cst_27 {dimension_numbers = #tpu.dot_dimension_numbers<[1], [0], [0], [1], [0, 0, 1, 1], [], []>} : vector<8x64xf32>, vector<64x64xf32>, vector<8x64xf32> -> vector<8x64xf32>
    %68 = vector.broadcast %66 : vector<1x64xf32> to vector<8x64xf32>
    %69 = arith.divf %67, %68 : vector<8x64xf32>
    %c0_28 = arith.constant 0 : index
    %c24 = arith.constant 24 : index
    %c0_29 = arith.constant 0 : index
    %70 = vector.load %arg3[%c0_28, %c24, %c0_29] : memref<2x32x64xf32, #tpu.memory_space<vmem>>, vector<1x8x64xf32>
    %71 = vector.shape_cast %70 : vector<1x8x64xf32> to vector<8x64xf32>
    %72 = vector.shape_cast %69 : vector<8x64xf32> to vector<1x8x64xf32>
    tpu.vector_store %arg3[%c0_28, %c24, %c0_29], %72 {strides = array<i32>} : memref<2x32x64xf32, #tpu.memory_space<vmem>>, vector<1x8x64xf32>,
    %c1 = arith.constant 1 : index
    %c0_30 = arith.constant 0 : index
    %c0_31 = arith.constant 0 : index
    %73 = vector.load %arg1[%c1, %c0_30, %c0_31] : memref<2x32x64xf32, #tpu.memory_space<vmem>>, vector<1x32x64xf32>
    %74 = vector.shape_cast %73 : vector<1x32x64xf32> to vector<32x64xf32>
    %cst_32 = arith.constant dense<0.000000e+00> : vector<96x64xf32>
    %75 = tpu.matmul %1, %74, %cst_32 {dimension_numbers = #tpu.dot_dimension_numbers<[1], [0], [0], [1], [0, 0, 1, 1], [], []>} : vector<96x32xf32>, vector<32x64xf32>, vector<96x64xf32> -> vector<96x64xf32>
    %76 = vector.extract_strided_slice %75 {offsets = [0, 0], sizes = [8, 64], strides = [1, 1]} : vector<96x64xf32> to vector<8x64xf32>
    %77 = vector.extract_strided_slice %75 {offsets = [8, 0], sizes = [8, 64], strides = [1, 1]} : vector<96x64xf32> to vector<8x64xf32>
    %78 = vector.extract_strided_slice %75 {offsets = [16, 0], sizes = [8, 64], strides = [1, 1]} : vector<96x64xf32> to vector<8x64xf32>
    %cst_33 = arith.constant dense<0.000000e+00> : vector<64x64xf32>
    %79 = tpu.matmul %77, %76, %cst_33 {dimension_numbers = #tpu.dot_dimension_numbers<[0], [0], [1], [1], [0, 1, 1, 1], [], []>} : vector<8x64xf32>, vector<8x64xf32>, vector<64x64xf32> -> vector<64x64xf32>
    %cst_34 = arith.constant dense<0xFF800000> : vector<64xf32>
    %80 = vector.multi_reduction <maximumf>, %79, %cst_34 [0] : vector<64x64xf32> to vector<64xf32>
    %81 = vector.shape_cast %80 : vector<64xf32> to vector<1x64xf32>
    %82 = vector.broadcast %81 : vector<1x64xf32> to vector<64x64xf32>
    %83 = arith.subf %79, %82 : vector<64x64xf32>
    %84 = math.exp %83 : vector<64x64xf32>
    %cst_35 = arith.constant dense<0.000000e+00> : vector<64xf32>
    %85 = vector.multi_reduction <add>, %84, %cst_35 [0] : vector<64x64xf32> to vector<64xf32>
    %86 = vector.shape_cast %85 : vector<64xf32> to vector<1x64xf32>
    %cst_36 = arith.constant dense<0.000000e+00> : vector<8x64xf32>
    %87 = tpu.matmul %78, %84, %cst_36 {dimension_numbers = #tpu.dot_dimension_numbers<[1], [0], [0], [1], [0, 0, 1, 1], [], []>} : vector<8x64xf32>, vector<64x64xf32>, vector<8x64xf32> -> vector<8x64xf32>
    %88 = vector.broadcast %86 : vector<1x64xf32> to vector<8x64xf32>
    %89 = arith.divf %87, %88 : vector<8x64xf32>
    %c1_37 = arith.constant 1 : index
    %c0_38 = arith.constant 0 : index
    %c0_39 = arith.constant 0 : index
    %90 = vector.load %arg3[%c1_37, %c0_38, %c0_39] : memref<2x32x64xf32, #tpu.memory_space<vmem>>, vector<1x8x64xf32>
    %91 = vector.shape_cast %90 : vector<1x8x64xf32> to vector<8x64xf32>
    %92 = vector.shape_cast %89 : vector<8x64xf32> to vector<1x8x64xf32>
    tpu.vector_store %arg3[%c1_37, %c0_38, %c0_39], %92 {strides = array<i32>} : memref<2x32x64xf32, #tpu.memory_space<vmem>>, vector<1x8x64xf32>,
    %93 = vector.extract_strided_slice %75 {offsets = [24, 0], sizes = [8, 64], strides = [1, 1]} : vector<96x64xf32> to vector<8x64xf32>
    %94 = vector.extract_strided_slice %75 {offsets = [32, 0], sizes = [8, 64], strides = [1, 1]} : vector<96x64xf32> to vector<8x64xf32>
    %95 = vector.extract_strided_slice %75 {offsets = [40, 0], sizes = [8, 64], strides = [1, 1]} : vector<96x64xf32> to vector<8x64xf32>
    %cst_40 = arith.constant dense<0.000000e+00> : vector<64x64xf32>
    %96 = tpu.matmul %94, %93, %cst_40 {dimension_numbers = #tpu.dot_dimension_numbers<[0], [0], [1], [1], [0, 1, 1, 1], [], []>} : vector<8x64xf32>, vector<8x64xf32>, vector<64x64xf32> -> vector<64x64xf32>
    %cst_41 = arith.constant dense<0xFF800000> : vector<64xf32>
    %97 = vector.multi_reduction <maximumf>, %96, %cst_41 [0] : vector<64x64xf32> to vector<64xf32>
    %98 = vector.shape_cast %97 : vector<64xf32> to vector<1x64xf32>
    %99 = vector.broadcast %98 : vector<1x64xf32> to vector<64x64xf32>
    %100 = arith.subf %96, %99 : vector<64x64xf32>
    %101 = math.exp %100 : vector<64x64xf32>
    %cst_42 = arith.constant dense<0.000000e+00> : vector<64xf32>
    %102 = vector.multi_reduction <add>, %101, %cst_42 [0] : vector<64x64xf32> to vector<64xf32>
    %103 = vector.shape_cast %102 : vector<64xf32> to vector<1x64xf32>
    %cst_43 = arith.constant dense<0.000000e+00> : vector<8x64xf32>
    %104 = tpu.matmul %95, %101, %cst_43 {dimension_numbers = #tpu.dot_dimension_numbers<[1], [0], [0], [1], [0, 0, 1, 1], [], []>} : vector<8x64xf32>, vector<64x64xf32>, vector<8x64xf32> -> vector<8x64xf32>
    %105 = vector.broadcast %103 : vector<1x64xf32> to vector<8x64xf32>
    %106 = arith.divf %104, %105 : vector<8x64xf32>
    %c1_44 = arith.constant 1 : index
    %c8_45 = arith.constant 8 : index
    %c0_46 = arith.constant 0 : index
    %107 = vector.load %arg3[%c1_44, %c8_45, %c0_46] : memref<2x32x64xf32, #tpu.memory_space<vmem>>, vector<1x8x64xf32>
    %108 = vector.shape_cast %107 : vector<1x8x64xf32> to vector<8x64xf32>
    %109 = vector.shape_cast %106 : vector<8x64xf32> to vector<1x8x64xf32>
    tpu.vector_store %arg3[%c1_44, %c8_45, %c0_46], %109 {strides = array<i32>} : memref<2x32x64xf32, #tpu.memory_space<vmem>>, vector<1x8x64xf32>,
    %110 = vector.extract_strided_slice %75 {offsets = [48, 0], sizes = [8, 64], strides = [1, 1]} : vector<96x64xf32> to vector<8x64xf32>
    %111 = vector.extract_strided_slice %75 {offsets = [56, 0], sizes = [8, 64], strides = [1, 1]} : vector<96x64xf32> to vector<8x64xf32>
    %112 = vector.extract_strided_slice %75 {offsets = [64, 0], sizes = [8, 64], strides = [1, 1]} : vector<96x64xf32> to vector<8x64xf32>
    %cst_47 = arith.constant dense<0.000000e+00> : vector<64x64xf32>
    %113 = tpu.matmul %111, %110, %cst_47 {dimension_numbers = #tpu.dot_dimension_numbers<[0], [0], [1], [1], [0, 1, 1, 1], [], []>} : vector<8x64xf32>, vector<8x64xf32>, vector<64x64xf32> -> vector<64x64xf32>
    %cst_48 = arith.constant dense<0xFF800000> : vector<64xf32>
    %114 = vector.multi_reduction <maximumf>, %113, %cst_48 [0] : vector<64x64xf32> to vector<64xf32>
    %115 = vector.shape_cast %114 : vector<64xf32> to vector<1x64xf32>
    %116 = vector.broadcast %115 : vector<1x64xf32> to vector<64x64xf32>
    %117 = arith.subf %113, %116 : vector<64x64xf32>
    %118 = math.exp %117 : vector<64x64xf32>
    %cst_49 = arith.constant dense<0.000000e+00> : vector<64xf32>
    %119 = vector.multi_reduction <add>, %118, %cst_49 [0] : vector<64x64xf32> to vector<64xf32>
    %120 = vector.shape_cast %119 : vector<64xf32> to vector<1x64xf32>
    %cst_50 = arith.constant dense<0.000000e+00> : vector<8x64xf32>
    %121 = tpu.matmul %112, %118, %cst_50 {dimension_numbers = #tpu.dot_dimension_numbers<[1], [0], [0], [1], [0, 0, 1, 1], [], []>} : vector<8x64xf32>, vector<64x64xf32>, vector<8x64xf32> -> vector<8x64xf32>
    %122 = vector.broadcast %120 : vector<1x64xf32> to vector<8x64xf32>
    %123 = arith.divf %121, %122 : vector<8x64xf32>
    %c1_51 = arith.constant 1 : index
    %c16_52 = arith.constant 16 : index
    %c0_53 = arith.constant 0 : index
    %124 = vector.load %arg3[%c1_51, %c16_52, %c0_53] : memref<2x32x64xf32, #tpu.memory_space<vmem>>, vector<1x8x64xf32>
    %125 = vector.shape_cast %124 : vector<1x8x64xf32> to vector<8x64xf32>
    %126 = vector.shape_cast %123 : vector<8x64xf32> to vector<1x8x64xf32>
    tpu.vector_store %arg3[%c1_51, %c16_52, %c0_53], %126 {strides = array<i32>} : memref<2x32x64xf32, #tpu.memory_space<vmem>>, vector<1x8x64xf32>,
    %127 = vector.extract_strided_slice %75 {offsets = [72, 0], sizes = [8, 64], strides = [1, 1]} : vector<96x64xf32> to vector<8x64xf32>
    %128 = vector.extract_strided_slice %75 {offsets = [80, 0], sizes = [8, 64], strides = [1, 1]} : vector<96x64xf32> to vector<8x64xf32>
    %129 = vector.extract_strided_slice %75 {offsets = [88, 0], sizes = [8, 64], strides = [1, 1]} : vector<96x64xf32> to vector<8x64xf32>
    %cst_54 = arith.constant dense<0.000000e+00> : vector<64x64xf32>
    %130 = tpu.matmul %128, %127, %cst_54 {dimension_numbers = #tpu.dot_dimension_numbers<[0], [0], [1], [1], [0, 1, 1, 1], [], []>} : vector<8x64xf32>, vector<8x64xf32>, vector<64x64xf32> -> vector<64x64xf32>
    %cst_55 = arith.constant dense<0xFF800000> : vector<64xf32>
    %131 = vector.multi_reduction <maximumf>, %130, %cst_55 [0] : vector<64x64xf32> to vector<64xf32>
    %132 = vector.shape_cast %131 : vector<64xf32> to vector<1x64xf32>
    %133 = vector.broadcast %132 : vector<1x64xf32> to vector<64x64xf32>
    %134 = arith.subf %130, %133 : vector<64x64xf32>
    %135 = math.exp %134 : vector<64x64xf32>
    %cst_56 = arith.constant dense<0.000000e+00> : vector<64xf32>
    %136 = vector.multi_reduction <add>, %135, %cst_56 [0] : vector<64x64xf32> to vector<64xf32>
    %137 = vector.shape_cast %136 : vector<64xf32> to vector<1x64xf32>
    %cst_57 = arith.constant dense<0.000000e+00> : vector<8x64xf32>
    %138 = tpu.matmul %129, %135, %cst_57 {dimension_numbers = #tpu.dot_dimension_numbers<[1], [0], [0], [1], [0, 0, 1, 1], [], []>} : vector<8x64xf32>, vector<64x64xf32>, vector<8x64xf32> -> vector<8x64xf32>
    %139 = vector.broadcast %137 : vector<1x64xf32> to vector<8x64xf32>
    %140 = arith.divf %138, %139 : vector<8x64xf32>
    %c1_58 = arith.constant 1 : index
    %c24_59 = arith.constant 24 : index
    %c0_60 = arith.constant 0 : index
    %141 = vector.load %arg3[%c1_58, %c24_59, %c0_60] : memref<2x32x64xf32, #tpu.memory_space<vmem>>, vector<1x8x64xf32>
    %142 = vector.shape_cast %141 : vector<1x8x64xf32> to vector<8x64xf32>
    %143 = vector.shape_cast %140 : vector<8x64xf32> to vector<1x8x64xf32>
    tpu.vector_store %arg3[%c1_58, %c24_59, %c0_60], %143 {strides = array<i32>} : memref<2x32x64xf32, #tpu.memory_space<vmem>>, vector<1x8x64xf32>,
    return
  }
  func.func @transform_0(%arg0: i32) -> (i32, i32, i32) {
    %c0_i32 = arith.constant 0 : i32
    %c0_i32_0 = arith.constant 0 : i32
    %c0_i32_1 = arith.constant 0 : i32
    %c0_i32_2 = arith.constant 0 : i32
    return %c0_i32, %c0_i32_0, %c0_i32_1 : i32, i32, i32
  }
  func.func @transform_1(%arg0: i32) -> (i32, i32, i32) {
    %c0_i32 = arith.constant 0 : i32
    %c0_i32_0 = arith.constant 0 : i32
    %c0_i32_1 = arith.constant 0 : i32
    return %arg0, %c0_i32, %c0_i32_0 : i32, i32, i32
  }
  func.func @transform_2(%arg0: i32) -> (i32, i32, i32) {
    %c0_i32 = arith.constant 0 : i32
    %c0_i32_0 = arith.constant 0 : i32
    %c0_i32_1 = arith.constant 0 : i32
    return %c0_i32, %arg0, %c0_i32_0 : i32, i32, i32
  }
}

</mosaic_0001>

<bundles_post_ra>
// kernel: global_sparse_attention.1
= control target key start
LH: loop header
LB: loop body
LE: loop exit
PB: predicated region body
PF: predicated region fallthrough
CT: control target
= control target key end

     0   :  { %vm27_vm0 = vcmask 261120   ;;  %vm221_vm1 = vcmask 64512   ;;  %v3605_v28 = vmov 0.0|0.0   ;;  %vm3606_vm2 = vmmov 0   ;;  %s4087_s0 = inlined_call_operand.vmem [shape: f32[2,32,64], index: 0, kind: input, shape index: {}]   ;;  %s4088_s1 = inlined_call_operand.vmem [shape: f32[1,96,32], index: 1, kind: input, shape index: {}]   ;;  %s4089_s2 = inlined_call_operand.vmem [shape: f32[2,32,64], index: 2, kind: output, shape index: {}]  }
   0x1   :  { %v23_v0 = vld [vmem:[%s4087_s0] sm:$0xff]  ;;  %v24_v1 = vld [vmem:[%s4087_s0 + $0x8] sm:$0xff]  ;;  %v25_v2 = vld [vmem:[%s4087_s0 + $0x10] sm:$0xff]  ;;  %v3607_v29 = vmov 0.0   ;;  %vm351_vm3 = vcmask 523264  }
   0x2   :  { %v3346_v3 = vpack.c.bf16 %v24_v1, %v23_v0  ;;  %v26_v4 = vld [vmem:[%s4087_s0 + $0x18] sm:$0xff]  ;;  %v3638_v5 = vld [vmem:[%s4088_s1] sm:$0xff]  ;;  %v3645_v7 = vld [vmem:[%s4088_s1 + $0x8] sm:$0xff] }
   0x3   :  { %v3350_v6 = vpack.c.bf16 %v26_v4, %v25_v2  ;;  %3038 = vmatprep.mubr.msk.f32.mxu0 %vm27_vm0, %v3638_v5  ;;  %v3652_v8 = vld [vmem:[%s4088_s1 + $0x10] sm:$0xff]  ;;  %v3657_v9 = vld [vmem:[%s4088_s1 + $0x18] sm:$0xff]  ;;  %v3662_v10 = vld [vmem:[%s4088_s1 + $0x20] sm:$0xff] }
   0x4   :  { %3347 = vmatprep.subr.bf16.mxu0 %v3346_v3  ;;  %v3673_v11 = vld [vmem:[%s4088_s1 + $0x28] sm:$0xff]  ;;  %v3694_v26 = vld [vmem:[%s4088_s1 + $0x30] sm:$0xff]  ;;  %v3701_v27 = vld [vmem:[%s4088_s1 + $0x38] sm:$0xff] }
   0x5   :  { %3349 = vmatpush3.bf16.msra.mxu0 %v3346_v3  ;;  %v3712_v30 = vld [vmem:[%s4088_s1 + $0x40] sm:$0xff]  ;;  %v3717_v31 = vld [vmem:[%s4088_s1 + $0x48] sm:$0xff]  ;;  %v3722_v32 = vld [vmem:[%s4088_s1 + $0x50] sm:$0xff] }
   0x6   :  { %3351 = vmatprep.subr.bf16.mxu0 %v3350_v6  ;;  %v3733_v33 = vld [vmem:[%s4088_s1 + $0x58] sm:$0xff] }
   0x9   :  { %3353 = vmatpush3.bf16.msra.mxu0 %v3350_v6 }
   0xa   :  { %3366 = vmatprep.subr.bf16.mxu0 %v3605_v28 }
   0xc   :  { %3039 = vmatmul.mubr.msk.f32.vlgmr.msra.gmra.mrb[0].mxu0 %vm27_vm0, %v3645_v7 }
   0xd   :  { %3041 = vmatprep.mubr.msk.f32.mxu0 %vm27_vm0, %v3652_v8 }
  0x10   :  { %3042 = vmatmul.mubr.msk.f32.gmra.mrb[2].mxu0 %vm27_vm0, %v3657_v9 }
  0x11   :  { %3044 = vmatprep.mubr.msk.f32.mxu0 %vm27_vm0, %v3662_v10 }
  0x14   :  { %3045 = vmatmul.mubr.msk.f32.gmra.mrb[4].mxu0 %vm27_vm0, %v3673_v11 }
  0x15   :  { %3047 = vmatprep.mubr.msk.f32.mxu0 %vm27_vm0, %v3694_v26 }
  0x18   :  { %3048 = vmatmul.mubr.msk.f32.gmra.mrb[6].mxu0 %vm27_vm0, %v3701_v27 }
  0x19   :  { %3050 = vmatprep.mubr.msk.f32.mxu0 %vm27_vm0, %v3712_v30 }
  0x1c   :  { %3051 = vmatmul.mubr.msk.f32.gmra.mrb[8].mxu0 %vm27_vm0, %v3717_v31 }
  0x1d   :  { %3053 = vmatprep.mubr.msk.f32.mxu0 %vm27_vm0, %v3722_v32 }
  0x20   :  { %3054 = vmatmul.mubr.msk.f32.gmra.mrb[10].mxu0 %vm27_vm0, %v3733_v33 }
  0x21   :  { %3119 = vmatprep.mubr.msk.f32.mxu0 %vm3606_vm2, %v3607_v29 }
  0xdf   :  { %v3040_v12 = vpop.f32.mrb[0].mxu0 }
  0xe0   :  { %189 = vxpose.xlu0.b32.start.end [1/1] (short) (narrow) %v3040_v12, 64  ;;  %v130_v13 = vpop.f32.mrb[1].mxu0 }
  0xe1   :  { %3056 = vmatprep.subr.mxu1 %v130_v13 }
  0xe2   :  { %3057 = vmatpush3.msra.mxu1 %v130_v13 }
  0xe3   :  { %v3677_v14 = vpop.f32.mrb[2].mxu0  ;;  %3354 = vmatprep.subr.bf16.mxu1 %v3605_v28 }
  0xe4   :  { %v3679_v15 = vpop.f32.mrb[3].mxu0 }
  0xe7   :  { %v3681_v16 = vpop.f32.mrb[4].mxu0 }
  0xe8   :  { %v150_v17 = vpop.f32.mrb[5].mxu0 }
  0xfd   :  { %494 = vxpose.xlu0.b32.start.end [1/1] (short) (narrow) %v150_v17, 64 }
 0x160   :  { %v205_v18 = vpop.trf.xlu0 }
 0x161   :  { %3058 = vmatprep.mubr.msk.f32.mxu1 %vm221_vm1, %v205_v18 }
 0x164   :  { %v206_v19 = vpop.trf.xlu0 }
 0x165   :  { %3059 = vmatmul.mubr.msk.f32.vlgmr.msra.gmra.mrb[0].mxu1 %vm221_vm1, %v206_v19 }
 0x168   :  { %v207_v20 = vpop.trf.xlu0 }
 0x169   :  { %3061 = vmatprep.mubr.msk.f32.mxu1 %vm221_vm1, %v207_v20 }
 0x16c   :  { %v208_v21 = vpop.trf.xlu0 }
 0x16d   :  { %3062 = vmatmul.mubr.msk.f32.gmra.mrb[2].mxu1 %vm221_vm1, %v208_v21 }
 0x170   :  { %v209_v22 = vpop.trf.xlu0 }
 0x171   :  { %3064 = vmatprep.mubr.msk.f32.mxu1 %vm221_vm1, %v209_v22 }
 0x174   :  { %v210_v23 = vpop.trf.xlu0 }
 0x175   :  { %3065 = vmatmul.mubr.msk.f32.gmra.mrb[4].mxu1 %vm221_vm1, %v210_v23 }
 0x178   :  { %v211_v24 = vpop.trf.xlu0 }
 0x179   :  { %3067 = vmatprep.mubr.msk.f32.mxu1 %vm221_vm1, %v211_v24 }
 0x17c   :  { %v212_v25 = vpop.trf.xlu0 }
 0x17d   :  { %3068 = vmatmul.mubr.msk.f32.gmra.mrb[6].mxu1 %vm221_vm1, %v212_v25 }
 0x17e   :  { %3086 = vmatprep.mubr.msk.f32.mxu1 %vm3606_vm2, %v3607_v29 }
 0x180   :  { %v510_v21 = vpop.trf.xlu0 }
 0x184   :  { %v511_v25 = vpop.trf.xlu0 }
 0x238   :  { %v3060_v34 = vpop.f32.mrb[0].mxu1 }
 0x239   :  { %v312_v35 = vpop.f32.mrb[1].mxu1  ;;  %v353_v39 = vsel %vm351_vm3, %v3060_v34, -inf }
 0x23a   :  { %v352_v42 = vsel %vm351_vm3, %v312_v35, -inf }
 0x240   :  { %v3063_v36 = vpop.f32.mrb[2].mxu1 }
 0x241   :  { %v322_v37 = vpop.f32.mrb[3].mxu1  ;;  %v355_v48 = vsel %vm351_vm3, %v3063_v36, -inf }
 0x242   :  { %v354_v51 = vsel %vm351_vm3, %v322_v37, -inf }
 0x248   :  { %v3066_v38 = vpop.f32.mrb[4].mxu1 }
 0x249   :  { %v358_v40 = vsel %vm351_vm3, %v3066_v38, -inf  ;;  %v332_v41 = vpop.f32.mrb[5].mxu1 }
 0x24a   :  { %v359_v43 = vmax.f32 %v353_v39, %v358_v40  ;;  %v356_v44 = vsel %vm351_vm3, %v332_v41, -inf  ;;  %v512_v40 = vpop.trf.xlu0 }
 0x24b   :  { %v357_v45 = vmax.f32 %v352_v42, %v356_v44 }
 0x24d   :  { %v364_v46 = vmax.f32 %v357_v45, %v359_v43 }
 0x250   :  { %v3069_v47 = vpop.f32.mrb[6].mxu1 }
 0x251   :  { %v362_v49 = vsel %vm351_vm3, %v3069_v47, -inf  ;;  %v342_v50 = vpop.f32.mrb[7].mxu1 }
 0x252   :  { %v363_v52 = vmax.f32 %v355_v48, %v362_v49  ;;  %v360_v53 = vsel %vm351_vm3, %v342_v50, -inf }
 0x253   :  { %v361_v54 = vmax.f32 %v354_v51, %v360_v53 }
 0x255   :  { %v365_v55 = vmax.f32 %v361_v54, %v363_v52 }
 0x257   :  { %v366_v56 = vmax.f32 %v364_v46, %v365_v55  ;;  %v513_v55 = vpop.trf.xlu0 }
 0x259   :  { %v367_v57 = vrot.slane %v366_v56, 4 }
 0x25b   :  { %v368_v58 = vmax.f32 %v366_v56, %v367_v57 }
 0x25d   :  { %v369_v59 = vrot.slane %v368_v58, 2 }
 0x25f   :  { %v370_v60 = vmax.f32 %v368_v58, %v369_v59 }
 0x261   :  { %v371_v61 = vrot.slane %v370_v60, 1 }
 0x263   :  { %v372_v62 = vmax.f32 %v370_v60, %v371_v61 }
 0x265   :  { %v373_v63 = vsub.f32 %v312_v35, %v372_v62  ;;  %v374_v0 = vsub.f32 %v3060_v34, %v372_v62  ;;  %v375_v1 = vsub.f32 %v322_v37, %v372_v62  ;;  %v376_v2 = vsub.f32 %v3063_v36, %v372_v62 }
 0x266   :  { %v377_v3 = vsub.f32 %v332_v41, %v372_v62  ;;  %v378_v4 = vsub.f32 %v3066_v38, %v372_v62  ;;  %v379_v6 = vsub.f32 %v342_v50, %v372_v62  ;;  %v380_v12 = vsub.f32 %v3069_v47, %v372_v62  ;;  %v514_v62 = vpop.trf.xlu0 }
 0x267   :  { %v381_v13 = vmul.f32 1.442695, %v373_v63  ;;  %v383_v17 = vmul.f32 1.442695, %v374_v0  ;;  %v385_v18 = vmul.f32 1.442695, %v375_v1 }
 0x268   :  { %v387_v19 = vmul.f32 1.442695, %v376_v2  ;;  %v389_v20 = vmul.f32 1.442695, %v377_v3  ;;  %v391_v22 = vmul.f32 1.442695, %v378_v4 }
 0x269   :  { %3461 = vpow2.f32 %v381_v13  ;;  %v393_v23 = vmul.f32 1.442695, %v379_v6  ;;  %v395_v24 = vmul.f32 1.442695, %v380_v12  ;;  %v3049_v2 = vpop.f32.mrb[6].mxu0 }
 0x26a   :  { %3463 = vpow2.f32 %v383_v17  ;;  %v515_v0 = vpop.trf.xlu0  ;;  %v3768_v3 = vpop.f32.mrb[7].mxu0  ;;  %797 = vxpose.xlu1.b32.start.end [1/1] (short) (narrow) %v3049_v2, 64 }
 0x26b   :  { %3465 = vpow2.f32 %v385_v18 }
 0x26c   :  { %3467 = vpow2.f32 %v387_v19 }
 0x26d   :  { %3469 = vpow2.f32 %v389_v20 }
 0x26e   :  { %3471 = vpow2.f32 %v391_v22  ;;  %v516_v1 = vpop.trf.xlu0 }
 0x26f   :  { %3473 = vpow2.f32 %v393_v23 }
 0x270   :  { %3475 = vpow2.f32 %v395_v24 }
 0x273   :  { %v3462_v34 = vpop.eup %3461 }
 0x274   :  { %v3464_v35 = vpop.eup %3463  ;;  %v397_v36 = vsel %vm351_vm3, %v3462_v34, 0.0 }
 0x275   :  { %v3466_v37 = vpop.eup %3465  ;;  %v398_v38 = vsel %vm351_vm3, %v3464_v35, 0.0  ;;  %v3355_v39 = vpack.c.bf16 %v3464_v35, %v3462_v34 }
 0x276   :  { %v3468_v41 = vpop.eup %3467  ;;  %v399_v42 = vadd.f32 %v398_v38, %v397_v36  ;;  %v400_v44 = vsel %vm351_vm3, %v3466_v37, 0.0 }
 0x277   :  { %v3470_v43 = vpop.eup %3469  ;;  %3356 = vmatpush3.bf16.msra.mxu1 %v3355_v39  ;;  %v3358_v45 = vpack.c.bf16 %v3468_v41, %v3466_v37  ;;  %v402_v49 = vsel %vm351_vm3, %v3468_v41, 0.0 }
 0x278   :  { %v3472_v46 = vpop.eup %3471  ;;  %v401_v47 = vadd.f32 %v400_v44, %v399_v42  ;;  %3357 = vmatprep.subr.bf16.mxu1 %v3605_v28  ;;  %v404_v53 = vsel %vm351_vm3, %v3470_v43, 0.0 }
 0x279   :  { %v3474_v48 = vpop.eup %3473  ;;  %v3361_v50 = vpack.c.bf16 %v3472_v46, %v3470_v43  ;;  %v406_v57 = vsel %vm351_vm3, %v3472_v46, 0.0 }
 0x27a   :  { %v3476_v51 = vpop.eup %3475  ;;  %v403_v52 = vadd.f32 %v402_v49, %v401_v47  ;;  %v408_v59 = vsel %vm351_vm3, %v3474_v48, 0.0 }
 0x27b   :  { %3359 = vmatpush3.bf16.msra.mxu1 %v3358_v45  ;;  %v3364_v54 = vpack.c.bf16 %v3476_v51, %v3474_v48  ;;  %v410_v61 = vsel %vm351_vm3, %v3476_v51, 0.0 }
 0x27c   :  { %v405_v56 = vadd.f32 %v404_v53, %v403_v52  ;;  %3360 = vmatprep.subr.bf16.mxu1 %v3605_v28 }
 0x27e   :  { %v407_v58 = vadd.f32 %v406_v57, %v405_v56 }
 0x27f   :  { %3362 = vmatpush3.bf16.msra.mxu1 %v3361_v50 }
 0x280   :  { %v409_v60 = vadd.f32 %v408_v59, %v407_v58  ;;  %3363 = vmatprep.subr.bf16.mxu1 %v3605_v28 }
 0x282   :  { %v411_v63 = vadd.f32 %v410_v61, %v409_v60 }
 0x283   :  { %3365 = vmatpush3.bf16.msra.mxu1 %v3364_v54 }
 0x284   :  { %3089 = vmatprep.subr.mxu1 %v3677_v14  ;;  %v412_v13 = vrot.slane %v411_v63, 4 }
 0x286   :  { %3087 = vmatmul.mubr.msk.f32.vlgmr.msra.gmra.mrb[8].mxu1 %vm351_vm3, %v3679_v15  ;;  %v3775_v15 = vpop.f32.mrb[8].mxu0  ;;  %v413_v17 = vadd.f32 %v412_v13, %v411_v63 }
 0x287   :  { %3090 = vmatpush3.msra.mxu1 %v3677_v14  ;;  %3091 = vmatprep.mubr.msk.f32.mxu1 %vm221_vm1, %v510_v21  ;;  %v517_v14 = vpop.trf.xlu0  ;;  %v3777_v4 = vpop.f32.mrb[9].mxu0 }
 0x288   :  { %3378 = vmatprep.subr.bf16.mxu1 %v3605_v28  ;;  %v3779_v6 = vpop.f32.mrb[10].mxu0  ;;  %v414_v18 = vrot.slane %v413_v17, 2 }
 0x289   :  { %v180_v12 = vpop.f32.mrb[11].mxu0 }
 0x28a   :  { %3092 = vmatmul.mubr.msk.f32.vlgmr.msra.gmra.mrb[10].mxu1 %vm221_vm1, %v511_v25  ;;  %1100 = vxpose.xlu1.b32.start.end [1/1] (short) (narrow) %v180_v12, 64  ;;  %v415_v19 = vadd.f32 %v414_v18, %v413_v17 }
 0x28b   :  { %3094 = vmatprep.mubr.msk.f32.mxu1 %vm221_vm1, %v512_v40 }
 0x28c   :  { %v416_v20 = vrot.slane %v415_v19, 1 }
 0x28e   :  { %3095 = vmatmul.mubr.msk.f32.gmra.mrb[12].mxu1 %vm221_vm1, %v513_v55  ;;  %v417_v21 = vadd.f32 %v416_v20, %v415_v19 }
 0x28f   :  { %3097 = vmatprep.mubr.msk.f32.mxu1 %vm221_vm1, %v514_v62 }
 0x290   :  { %3477 = vrcp.f32 %v417_v21 }
 0x292   :  { %3098 = vmatmul.mubr.msk.f32.gmra.mrb[14].mxu1 %vm221_vm1, %v515_v0 }
 0x293   :  { %3100 = vmatprep.mubr.msk.f32.mxu1 %vm221_vm1, %v516_v1 }
 0x296   :  { %3101 = vmatmul.mubr.msk.f32.gmra.mrb[16].mxu1 %vm221_vm1, %v517_v14 }
 0x297   :  { %3152 = vmatprep.mubr.msk.f32.mxu1 %vm3606_vm2, %v3607_v29 }
 0x29a   :  { %v3478_v22 = vpop.eup %3477 }
 0x359   :  { %v487_v23 = vpop.f32.mrb[8].mxu1 }
 0x35a   :  { %v492_v24 = vmul.f32 %v3478_v22, %v487_v23  ;;  %v3088_v25 = vpop.f32.mrb[9].mxu1  ;;  %v813_v23 = vpop.trf.xlu1 }
 0x35c   :  { %493 = vst.msk [vmem:[%s4089_s2] sm:$0xff] %vm351_vm3, %v492_v24 }
 0x35d   :  { %v3093_v34 = vpop.f32.mrb[10].mxu1 }
 0x35e   :  { %v616_v35 = vpop.f32.mrb[11].mxu1  ;;  %v656_v39 = vsel %vm351_vm3, %v3093_v34, -inf }
 0x35f   :  { %v655_v42 = vsel %vm351_vm3, %v616_v35, -inf }
 0x361   :  { %v3096_v36 = vpop.f32.mrb[12].mxu1 }
 0x362   :  { %v626_v37 = vpop.f32.mrb[13].mxu1  ;;  %v658_v47 = vsel %vm351_vm3, %v3096_v36, -inf }
 0x363   :  { %v657_v51 = vsel %vm351_vm3, %v626_v37, -inf }
 0x365   :  { %v3099_v38 = vpop.f32.mrb[14].mxu1 }
 0x366   :  { %v661_v40 = vsel %vm351_vm3, %v3099_v38, -inf  ;;  %v636_v41 = vpop.f32.mrb[15].mxu1 }
 0x367   :  { %v662_v43 = vmax.f32 %v656_v39, %v661_v40  ;;  %v659_v44 = vsel %vm351_vm3, %v636_v41, -inf }
 0x368   :  { %v660_v45 = vmax.f32 %v655_v42, %v659_v44 }
 0x369   :  { %v3102_v46 = vpop.f32.mrb[16].mxu1 }
 0x36a   :  { %v667_v48 = vmax.f32 %v660_v45, %v662_v43  ;;  %v665_v49 = vsel %vm351_vm3, %v3102_v46, -inf  ;;  %v646_v50 = vpop.f32.mrb[17].mxu1 }
 0x36b   :  { %v666_v52 = vmax.f32 %v658_v47, %v665_v49  ;;  %v663_v53 = vsel %vm351_vm3, %v646_v50, -inf }
 0x36c   :  { %v664_v54 = vmax.f32 %v657_v51, %v663_v53 }
 0x36e   :  { %v668_v55 = vmax.f32 %v664_v54, %v666_v52 }
 0x370   :  { %v669_v56 = vmax.f32 %v667_v48, %v668_v55 }
 0x372   :  { %v670_v57 = vrot.slane %v669_v56, 4 }
 0x374   :  { %v671_v58 = vmax.f32 %v669_v56, %v670_v57 }
 0x376   :  { %v672_v59 = vrot.slane %v671_v58, 2 }
 0x378   :  { %v673_v60 = vmax.f32 %v671_v58, %v672_v59 }
 0x37a   :  { %v674_v61 = vrot.slane %v673_v60, 1 }
 0x37c   :  { %v675_v62 = vmax.f32 %v673_v60, %v674_v61 }
 0x37e   :  { %v676_v63 = vsub.f32 %v616_v35, %v675_v62  ;;  %v677_v0 = vsub.f32 %v3093_v34, %v675_v62  ;;  %v678_v1 = vsub.f32 %v626_v37, %v675_v62  ;;  %v679_v2 = vsub.f32 %v3096_v36, %v675_v62  ;;  %v814_v34 = vpop.trf.xlu1 }
 0x37f   :  { %v680_v14 = vsub.f32 %v636_v41, %v675_v62  ;;  %v681_v12 = vsub.f32 %v3099_v38, %v675_v62  ;;  %v682_v13 = vsub.f32 %v646_v50, %v675_v62  ;;  %v683_v17 = vsub.f32 %v3102_v46, %v675_v62 }
 0x380   :  { %v684_v18 = vmul.f32 1.442695, %v676_v63  ;;  %v686_v19 = vmul.f32 1.442695, %v677_v0  ;;  %v688_v20 = vmul.f32 1.442695, %v678_v1 }
 0x381   :  { %v690_v21 = vmul.f32 1.442695, %v679_v2  ;;  %v692_v22 = vmul.f32 1.442695, %v680_v14  ;;  %v694_v24 = vmul.f32 1.442695, %v681_v12 }
 0x382   :  { %3479 = vpow2.f32 %v684_v18  ;;  %v696_v25 = vmul.f32 1.442695, %v682_v13  ;;  %v698_v35 = vmul.f32 1.442695, %v683_v17  ;;  %v815_v42 = vpop.trf.xlu1 }
 0x383   :  { %3481 = vpow2.f32 %v686_v19 }
 0x384   :  { %3483 = vpow2.f32 %v688_v20 }
 0x385   :  { %3485 = vpow2.f32 %v690_v21 }
 0x386   :  { %3487 = vpow2.f32 %v692_v22  ;;  %v816_v57 = vpop.trf.xlu1 }
 0x387   :  { %3489 = vpow2.f32 %v694_v24 }
 0x388   :  { %3491 = vpow2.f32 %v696_v25 }
 0x389   :  { %3493 = vpow2.f32 %v698_v35 }
 0x38a   :  { %v817_v0 = vpop.trf.xlu1 }
 0x38c   :  { %v3480_v36 = vpop.eup %3479 }
 0x38d   :  { %v3482_v37 = vpop.eup %3481  ;;  %v700_v38 = vsel %vm351_vm3, %v3480_v36, 0.0 }
 0x38e   :  { %v3484_v39 = vpop.eup %3483  ;;  %v701_v40 = vsel %vm351_vm3, %v3482_v37, 0.0  ;;  %v3367_v41 = vpack.c.bf16 %v3482_v37, %v3480_v36  ;;  %v818_v2 = vpop.trf.xlu1 }
 0x38f   :  { %v3486_v43 = vpop.eup %3485  ;;  %v702_v44 = vadd.f32 %v701_v40, %v700_v38  ;;  %v703_v46 = vsel %vm351_vm3, %v3484_v39, 0.0 }
 0x390   :  { %v3488_v45 = vpop.eup %3487  ;;  %3368 = vmatpush3.bf16.msra.mxu0 %v3367_v41  ;;  %v3370_v47 = vpack.c.bf16 %v3486_v43, %v3484_v39  ;;  %v705_v51 = vsel %vm351_vm3, %v3486_v43, 0.0 }
 0x391   :  { %v3490_v48 = vpop.eup %3489  ;;  %v704_v49 = vadd.f32 %v703_v46, %v702_v44  ;;  %3369 = vmatprep.subr.bf16.mxu0 %v3605_v28  ;;  %v707_v55 = vsel %vm351_vm3, %v3488_v45, 0.0 }
 0x392   :  { %v3492_v50 = vpop.eup %3491  ;;  %v3373_v52 = vpack.c.bf16 %v3490_v48, %v3488_v45  ;;  %v709_v59 = vsel %vm351_vm3, %v3490_v48, 0.0  ;;  %v819_v14 = vpop.trf.xlu1 }
 0x393   :  { %v3494_v53 = vpop.eup %3493  ;;  %v706_v54 = vadd.f32 %v705_v51, %v704_v49  ;;  %v711_v61 = vsel %vm351_vm3, %v3492_v50, 0.0 }
 0x394   :  { %3371 = vmatpush3.bf16.msra.mxu0 %v3370_v47  ;;  %v3376_v56 = vpack.c.bf16 %v3494_v53, %v3492_v50  ;;  %v713_v63 = vsel %vm351_vm3, %v3494_v53, 0.0 }
 0x395   :  { %v708_v58 = vadd.f32 %v707_v55, %v706_v54  ;;  %3372 = vmatprep.subr.bf16.mxu0 %v3605_v28 }
 0x397   :  { %v710_v60 = vadd.f32 %v709_v59, %v708_v58 }
 0x398   :  { %3374 = vmatpush3.bf16.msra.mxu0 %v3373_v52 }
 0x399   :  { %v712_v62 = vadd.f32 %v711_v61, %v710_v60  ;;  %3375 = vmatprep.subr.bf16.mxu0 %v3605_v28 }
 0x39b   :  { %v714_v1 = vadd.f32 %v713_v63, %v712_v62 }
 0x39c   :  { %3377 = vmatpush3.bf16.msra.mxu0 %v3376_v56 }
 0x39d   :  { %3122 = vmatprep.subr.mxu0 %v3768_v3 }
 0x39f   :  { %3120 = vmatmul.mubr.msk.f32.vlgmr.msra.gmra.mrb[12].mxu0 %vm351_vm3, %v3681_v16  ;;  %v820_v16 = vpop.trf.xlu1 }
 0x3a0   :  { %3123 = vmatpush3.msra.mxu0 %v3768_v3  ;;  %3124 = vmatprep.mubr.msk.f32.mxu0 %vm221_vm1, %v813_v23  ;;  %v715_v3 = vrot.slane %v714_v1, 4 }
 0x3a1   :  { %3390 = vmatprep.subr.bf16.mxu0 %v3605_v28 }
 0x3a2   :  { %v716_v12 = vadd.f32 %v715_v3, %v714_v1 }
 0x3a3   :  { %3125 = vmatmul.mubr.msk.f32.vlgmr.msra.gmra.mrb[14].mxu0 %vm221_vm1, %v814_v34 }
 0x3a4   :  { %3127 = vmatprep.mubr.msk.f32.mxu0 %vm221_vm1, %v815_v42  ;;  %v717_v13 = vrot.slane %v716_v12, 2 }
 0x3a6   :  { %v718_v17 = vadd.f32 %v717_v13, %v716_v12 }
 0x3a7   :  { %3128 = vmatmul.mubr.msk.f32.gmra.mrb[16].mxu0 %vm221_vm1, %v816_v57 }
 0x3a8   :  { %3130 = vmatprep.mubr.msk.f32.mxu0 %vm221_vm1, %v817_v0  ;;  %v719_v18 = vrot.slane %v718_v17, 1 }
 0x3aa   :  { %v720_v19 = vadd.f32 %v719_v18, %v718_v17 }
 0x3ab   :  { %3131 = vmatmul.mubr.msk.f32.gmra.mrb[18].mxu0 %vm221_vm1, %v818_v2 }
 0x3ac   :  { %3133 = vmatprep.mubr.msk.f32.mxu0 %vm221_vm1, %v819_v14  ;;  %3495 = vrcp.f32 %v720_v19  ;;  %v1116_v19 = vpop.trf.xlu1 }
 0x3af   :  { %3134 = vmatmul.mubr.msk.f32.gmra.mrb[20].mxu0 %vm221_vm1, %v820_v16 }
 0x3b0   :  { %3185 = vmatprep.mubr.msk.f32.mxu0 %vm3606_vm2, %v3607_v29 }
 0x3b6   :  { %v3496_v20 = vpop.eup %3495 }
 0x472   :  { %v790_v21 = vpop.f32.mrb[12].mxu0 }
 0x473   :  { %v795_v22 = vmul.f32 %v3496_v20, %v790_v21  ;;  %v3121_v23 = vpop.f32.mrb[13].mxu0 }
 0x474   :  { %v1117_v23 = vpop.trf.xlu1 }
 0x475   :  { %796 = vst.msk [vmem:[%s4089_s2 + $0x8] sm:$0xff] %vm351_vm3, %v795_v22 }
 0x476   :  { %v3126_v24 = vpop.f32.mrb[14].mxu0 }
 0x477   :  { %v919_v25 = vpop.f32.mrb[15].mxu0  ;;  %v959_v37 = vsel %vm351_vm3, %v3126_v24, -inf }
 0x478   :  { %v958_v40 = vsel %vm351_vm3, %v919_v25, -inf }
 0x47a   :  { %v3129_v35 = vpop.f32.mrb[16].mxu0 }
 0x47b   :  { %v929_v34 = vpop.f32.mrb[17].mxu0  ;;  %v961_v45 = vsel %vm351_vm3, %v3129_v35, -inf }
 0x47c   :  { %v960_v49 = vsel %vm351_vm3, %v929_v34, -inf }
 0x47e   :  { %v3132_v36 = vpop.f32.mrb[18].mxu0 }
 0x47f   :  { %v964_v38 = vsel %vm351_vm3, %v3132_v36, -inf  ;;  %v939_v39 = vpop.f32.mrb[19].mxu0 }
 0x480   :  { %v965_v41 = vmax.f32 %v959_v37, %v964_v38  ;;  %v962_v42 = vsel %vm351_vm3, %v939_v39, -inf  ;;  %v1118_v38 = vpop.trf.xlu1 }
 0x481   :  { %v963_v43 = vmax.f32 %v958_v40, %v962_v42 }
 0x482   :  { %v3135_v44 = vpop.f32.mrb[20].mxu0 }
 0x483   :  { %v970_v46 = vmax.f32 %v963_v43, %v965_v41  ;;  %v968_v47 = vsel %vm351_vm3, %v3135_v44, -inf  ;;  %v949_v48 = vpop.f32.mrb[21].mxu0 }
 0x484   :  { %v969_v50 = vmax.f32 %v961_v45, %v968_v47  ;;  %v966_v51 = vsel %vm351_vm3, %v949_v48, -inf }
 0x485   :  { %v967_v52 = vmax.f32 %v960_v49, %v966_v51 }
 0x487   :  { %v971_v53 = vmax.f32 %v967_v52, %v969_v50 }
 0x489   :  { %v972_v54 = vmax.f32 %v970_v46, %v971_v53  ;;  %v1119_v53 = vpop.trf.xlu1 }
 0x48b   :  { %v973_v55 = vrot.slane %v972_v54, 4 }
 0x48d   :  { %v974_v56 = vmax.f32 %v972_v54, %v973_v55 }
 0x48f   :  { %v975_v57 = vrot.slane %v974_v56, 2 }
 0x491   :  { %v976_v58 = vmax.f32 %v974_v56, %v975_v57 }
 0x493   :  { %v977_v59 = vrot.slane %v976_v58, 1 }
 0x495   :  { %v978_v60 = vmax.f32 %v976_v58, %v977_v59 }
 0x497   :  { %v979_v61 = vsub.f32 %v919_v25, %v978_v60  ;;  %v980_v62 = vsub.f32 %v3126_v24, %v978_v60  ;;  %v981_v63 = vsub.f32 %v929_v34, %v978_v60  ;;  %v982_v0 = vsub.f32 %v3129_v35, %v978_v60 }
 0x498   :  { %v983_v1 = vsub.f32 %v939_v39, %v978_v60  ;;  %v984_v2 = vsub.f32 %v3132_v36, %v978_v60  ;;  %v985_v14 = vsub.f32 %v949_v48, %v978_v60  ;;  %v986_v16 = vsub.f32 %v3135_v44, %v978_v60  ;;  %v1120_v60 = vpop.trf.xlu1 }
 0x499   :  { %v987_v3 = vmul.f32 1.442695, %v979_v61  ;;  %v989_v12 = vmul.f32 1.442695, %v980_v62  ;;  %v991_v13 = vmul.f32 1.442695, %v981_v63 }
 0x49a   :  { %v993_v17 = vmul.f32 1.442695, %v982_v0  ;;  %v995_v18 = vmul.f32 1.442695, %v983_v1  ;;  %v997_v20 = vmul.f32 1.442695, %v984_v2 }
 0x49b   :  { %3497 = vpow2.f32 %v987_v3  ;;  %v999_v21 = vmul.f32 1.442695, %v985_v14  ;;  %v1001_v22 = vmul.f32 1.442695, %v986_v16  ;;  %v2798_v61 = vld [vmem:[%s4087_s0 + $0x20] sm:$0xff]  ;;  %v2799_v62 = vld [vmem:[%s4087_s0 + $0x28] sm:$0xff] }
 0x49c   :  { %3499 = vpow2.f32 %v989_v12  ;;  %v3402_v0 = vpack.c.bf16 %v2799_v62, %v2798_v61  ;;  %v2800_v1 = vld [vmem:[%s4087_s0 + $0x30] sm:$0xff]  ;;  %v2801_v2 = vld [vmem:[%s4087_s0 + $0x38] sm:$0xff]  ;;  %v1121_v14 = vpop.trf.xlu1 }
 0x49d   :  { %3501 = vpow2.f32 %v991_v13  ;;  %v3406_v16 = vpack.c.bf16 %v2801_v2, %v2800_v1 }
 0x49e   :  { %3503 = vpow2.f32 %v993_v17 }
 0x49f   :  { %3505 = vpow2.f32 %v995_v18 }
 0x4a0   :  { %3507 = vpow2.f32 %v997_v20  ;;  %v1122_v3 = vpop.trf.xlu1 }
 0x4a1   :  { %3509 = vpow2.f32 %v999_v21 }
 0x4a2   :  { %3511 = vpow2.f32 %v1001_v22 }
 0x4a5   :  { %v3498_v24 = vpop.eup %3497 }
 0x4a6   :  { %v3500_v25 = vpop.eup %3499  ;;  %v1003_v35 = vsel %vm351_vm3, %v3498_v24, 0.0 }
 0x4a7   :  { %v3502_v34 = vpop.eup %3501  ;;  %v1004_v36 = vsel %vm351_vm3, %v3500_v25, 0.0  ;;  %v3379_v37 = vpack.c.bf16 %v3500_v25, %v3498_v24 }
 0x4a8   :  { %v3504_v39 = vpop.eup %3503  ;;  %v1005_v40 = vadd.f32 %v1004_v36, %v1003_v35  ;;  %v1006_v42 = vsel %vm351_vm3, %v3502_v34, 0.0 }
 0x4a9   :  { %v3506_v41 = vpop.eup %3505  ;;  %3380 = vmatpush3.bf16.msra.mxu1 %v3379_v37  ;;  %v3382_v43 = vpack.c.bf16 %v3504_v39, %v3502_v34  ;;  %v1008_v47 = vsel %vm351_vm3, %v3504_v39, 0.0 }
 0x4aa   :  { %v3508_v44 = vpop.eup %3507  ;;  %v1007_v45 = vadd.f32 %v1006_v42, %v1005_v40  ;;  %3381 = vmatprep.subr.bf16.mxu1 %v3605_v28  ;;  %v1010_v51 = vsel %vm351_vm3, %v3506_v41, 0.0 }
 0x4ab   :  { %v3510_v46 = vpop.eup %3509  ;;  %v3385_v48 = vpack.c.bf16 %v3508_v44, %v3506_v41  ;;  %v1012_v55 = vsel %vm351_vm3, %v3508_v44, 0.0 }
 0x4ac   :  { %v3512_v49 = vpop.eup %3511  ;;  %v1009_v50 = vadd.f32 %v1008_v47, %v1007_v45  ;;  %v1014_v57 = vsel %vm351_vm3, %v3510_v46, 0.0 }
 0x4ad   :  { %3383 = vmatpush3.bf16.msra.mxu1 %v3382_v43  ;;  %v3388_v52 = vpack.c.bf16 %v3512_v49, %v3510_v46  ;;  %v1016_v59 = vsel %vm351_vm3, %v3512_v49, 0.0 }
 0x4ae   :  { %v1011_v54 = vadd.f32 %v1010_v51, %v1009_v50  ;;  %3384 = vmatprep.subr.bf16.mxu1 %v3605_v28 }
 0x4b0   :  { %v1013_v56 = vadd.f32 %v1012_v55, %v1011_v54 }
 0x4b1   :  { %3386 = vmatpush3.bf16.msra.mxu1 %v3385_v48 }
 0x4b2   :  { %v1015_v58 = vadd.f32 %v1014_v57, %v1013_v56  ;;  %3387 = vmatprep.subr.bf16.mxu1 %v3605_v28 }
 0x4b4   :  { %v1017_v63 = vadd.f32 %v1016_v59, %v1015_v58 }
 0x4b5   :  { %3389 = vmatpush3.bf16.msra.mxu1 %v3388_v52 }
 0x4b6   :  { %3155 = vmatprep.subr.mxu1 %v3775_v15 }
 0x4b8   :  { %3153 = vmatmul.mubr.msk.f32.vlgmr.msra.gmra.mrb[18].mxu1 %vm351_vm3, %v3777_v4 }
 0x4b9   :  { %3156 = vmatpush3.msra.mxu1 %v3775_v15  ;;  %3157 = vmatprep.mubr.msk.f32.mxu1 %vm221_vm1, %v1116_v19  ;;  %v1123_v15 = vpop.trf.xlu1 }
 0x4ba   :  { %3403 = vmatprep.subr.bf16.mxu1 %v3402_v0 }
 0x4bc   :  { %3158 = vmatmul.mubr.msk.f32.vlgmr.msra.gmra.mrb[20].mxu1 %vm221_vm1, %v1117_v23 }
 0x4bd   :  { %3160 = vmatprep.mubr.msk.f32.mxu1 %vm221_vm1, %v1118_v38  ;;  %3405 = vmatpush3.bf16.msra.mxu1 %v3402_v0 }
 0x4be   :  { %3407 = vmatprep.subr.bf16.mxu1 %v3406_v16 }
 0x4c0   :  { %3161 = vmatmul.mubr.msk.f32.gmra.mrb[22].mxu1 %vm221_vm1, %v1119_v53 }
 0x4c1   :  { %3163 = vmatprep.mubr.msk.f32.mxu1 %vm221_vm1, %v1120_v60  ;;  %3409 = vmatpush3.bf16.msra.mxu1 %v3406_v16 }
 0x4c2   :  { %3422 = vmatprep.subr.bf16.mxu1 %v3605_v28 }
 0x4c4   :  { %3164 = vmatmul.mubr.msk.f32.gmra.mrb[24].mxu1 %vm221_vm1, %v1121_v14 }
 0x4c5   :  { %3166 = vmatprep.mubr.msk.f32.mxu1 %vm221_vm1, %v1122_v3 }
 0x4c8   :  { %3167 = vmatmul.mubr.msk.f32.gmra.mrb[26].mxu1 %vm221_vm1, %v1123_v15 }
 0x4c9   :  { %3196 = vmatprep.mubr.msk.f32.mxu1 %vm27_vm0, %v3638_v5  ;;  %v1018_v5 = vrot.slane %v1017_v63, 4 }
 0x4cc   :  { %3197 = vmatmul.mubr.msk.f32.vlgmr.msra.gmra.mrb[28].mxu1 %vm27_vm0, %v3645_v7  ;;  %v1019_v7 = vadd.f32 %v1018_v5, %v1017_v63 }
 0x4cd   :  { %3199 = vmatprep.mubr.msk.f32.mxu1 %vm27_vm0, %v3652_v8 }
 0x4ce   :  { %v1020_v8 = vrot.slane %v1019_v7, 2 }
 0x4d0   :  { %3200 = vmatmul.mubr.msk.f32.gmra.mrb[30].mxu1 %vm27_vm0, %v3657_v9  ;;  %v1021_v9 = vadd.f32 %v1020_v8, %v1019_v7 }
 0x4d1   :  { %3202 = vmatprep.mubr.msk.f32.mxu1 %vm27_vm0, %v3662_v10 }
 0x4d2   :  { %v1022_v10 = vrot.slane %v1021_v9, 1 }
 0x4d4   :  { %3203 = vmatmul.mubr.msk.f32.gmra.mrb[32].mxu1 %vm27_vm0, %v3673_v11  ;;  %v1023_v11 = vadd.f32 %v1022_v10, %v1021_v9 }
 0x4d5   :  { %3205 = vmatprep.mubr.msk.f32.mxu1 %vm27_vm0, %v3694_v26 }
 0x4d6   :  { %3513 = vrcp.f32 %v1023_v11 }
 0x4d8   :  { %3206 = vmatmul.mubr.msk.f32.gmra.mrb[34].mxu1 %vm27_vm0, %v3701_v27 }
 0x4d9   :  { %3208 = vmatprep.mubr.msk.f32.mxu1 %vm27_vm0, %v3712_v30 }
 0x4dc   :  { %3209 = vmatmul.mubr.msk.f32.gmra.mrb[36].mxu1 %vm27_vm0, %v3717_v31 }
 0x4dd   :  { %3211 = vmatprep.mubr.msk.f32.mxu1 %vm27_vm0, %v3722_v32 }
 0x4e0   :  { %3212 = vmatmul.mubr.msk.f32.gmra.mrb[38].mxu1 %vm27_vm0, %v3733_v33  ;;  %v3514_v26 = vpop.eup %3513 }
 0x4e1   :  { %3277 = vmatprep.mubr.msk.f32.mxu1 %vm3606_vm2, %v3607_v29 }
 0x58b   :  { %v1093_v27 = vpop.f32.mrb[18].mxu1 }
 0x58c   :  { %v1098_v30 = vmul.f32 %v3514_v26, %v1093_v27  ;;  %v3154_v31 = vpop.f32.mrb[19].mxu1 }
 0x58e   :  { %1099 = vst.msk [vmem:[%s4089_s2 + $0x10] sm:$0xff] %vm351_vm3, %v1098_v30 }
 0x58f   :  { %v3159_v32 = vpop.f32.mrb[20].mxu1 }
 0x590   :  { %v1222_v33 = vpop.f32.mrb[21].mxu1  ;;  %v1262_v17 = vsel %vm351_vm3, %v3159_v32, -inf }
 0x591   :  { %v1261_v20 = vsel %vm351_vm3, %v1222_v33, -inf }
 0x593   :  { %v3162_v4 = vpop.f32.mrb[22].mxu1 }
 0x594   :  { %v1232_v12 = vpop.f32.mrb[23].mxu1  ;;  %v1264_v25 = vsel %vm351_vm3, %v3162_v4, -inf }
 0x595   :  { %v1263_v37 = vsel %vm351_vm3, %v1232_v12, -inf }
 0x597   :  { %v3165_v13 = vpop.f32.mrb[24].mxu1 }
 0x598   :  { %v1267_v18 = vsel %vm351_vm3, %v3165_v13, -inf  ;;  %v1242_v19 = vpop.f32.mrb[25].mxu1 }
 0x599   :  { %v1268_v21 = vmax.f32 %v1262_v17, %v1267_v18  ;;  %v1265_v22 = vsel %vm351_vm3, %v1242_v19, -inf }
 0x59a   :  { %v1266_v23 = vmax.f32 %v1261_v20, %v1265_v22 }
 0x59b   :  { %v3168_v24 = vpop.f32.mrb[26].mxu1 }
 0x59c   :  { %v1273_v35 = vmax.f32 %v1266_v23, %v1268_v21  ;;  %v1271_v34 = vsel %vm351_vm3, %v3168_v24, -inf  ;;  %v1252_v36 = vpop.f32.mrb[27].mxu1 }
 0x59d   :  { %v1272_v38 = vmax.f32 %v1264_v25, %v1271_v34  ;;  %v1269_v39 = vsel %vm351_vm3, %v1252_v36, -inf }
 0x59e   :  { %v1270_v40 = vmax.f32 %v1263_v37, %v1269_v39 }
 0x59f   :  { %v3198_v41 = vpop.f32.mrb[28].mxu1 }
 0x5a0   :  { %v1274_v42 = vmax.f32 %v1270_v40, %v1272_v38  ;;  %1533 = vxpose.xlu0.b32.start.end [1/1] (short) (narrow) %v3198_v41, 64  ;;  %v3905_v43 = vpop.f32.mrb[29].mxu1 }
 0x5a2   :  { %v1275_v44 = vmax.f32 %v1273_v35, %v1274_v42 }
 0x5a3   :  { %v3925_v34 = vpop.f32.mrb[30].mxu1 }
 0x5a4   :  { %v1276_v45 = vrot.slane %v1275_v44, 4  ;;  %v3927_v37 = vpop.f32.mrb[31].mxu1 }
 0x5a6   :  { %v1277_v46 = vmax.f32 %v1275_v44, %v1276_v45 }
 0x5a7   :  { %v3930_v38 = vpop.f32.mrb[32].mxu1 }
 0x5a8   :  { %v1278_v47 = vrot.slane %v1277_v46, 2 }
 0x5aa   :  { %v1279_v48 = vmax.f32 %v1277_v46, %v1278_v47 }
 0x5ac   :  { %v1280_v49 = vrot.slane %v1279_v48, 1 }
 0x5ae   :  { %v1281_v50 = vmax.f32 %v1279_v48, %v1280_v49 }
 0x5b0   :  { %v1282_v51 = vsub.f32 %v1222_v33, %v1281_v50  ;;  %v1283_v52 = vsub.f32 %v3159_v32, %v1281_v50  ;;  %v1284_v53 = vsub.f32 %v1232_v12, %v1281_v50  ;;  %v1285_v54 = vsub.f32 %v3162_v4, %v1281_v50 }
 0x5b1   :  { %v1286_v55 = vsub.f32 %v1242_v19, %v1281_v50  ;;  %v1287_v56 = vsub.f32 %v3165_v13, %v1281_v50  ;;  %v1288_v57 = vsub.f32 %v1252_v36, %v1281_v50  ;;  %v1289_v58 = vsub.f32 %v3168_v24, %v1281_v50 }
 0x5b2   :  { %v1290_v59 = vmul.f32 1.442695, %v1282_v51  ;;  %v1292_v60 = vmul.f32 1.442695, %v1283_v52  ;;  %v1294_v61 = vmul.f32 1.442695, %v1284_v53 }
 0x5b3   :  { %v1296_v62 = vmul.f32 1.442695, %v1285_v54  ;;  %v1298_v63 = vmul.f32 1.442695, %v1286_v55  ;;  %v1300_v0 = vmul.f32 1.442695, %v1287_v56 }
 0x5b4   :  { %3515 = vpow2.f32 %v1290_v59  ;;  %v1302_v1 = vmul.f32 1.442695, %v1288_v57  ;;  %v1304_v2 = vmul.f32 1.442695, %v1289_v58 }
 0x5b5   :  { %3517 = vpow2.f32 %v1292_v60 }
 0x5b6   :  { %3519 = vpow2.f32 %v1294_v61 }
 0x5b7   :  { %3521 = vpow2.f32 %v1296_v62 }
 0x5b8   :  { %3523 = vpow2.f32 %v1298_v63 }
 0x5b9   :  { %3525 = vpow2.f32 %v1300_v0 }
 0x5ba   :  { %3527 = vpow2.f32 %v1302_v1 }
 0x5bb   :  { %3529 = vpow2.f32 %v1304_v2 }
 0x5be   :  { %v3516_v14 = vpop.eup %3515 }
 0x5bf   :  { %v3518_v16 = vpop.eup %3517  ;;  %v1306_v3 = vsel %vm351_vm3, %v3516_v14, 0.0 }
 0x5c0   :  { %v3520_v15 = vpop.eup %3519  ;;  %v1307_v5 = vsel %vm351_vm3, %v3518_v16, 0.0  ;;  %v3391_v7 = vpack.c.bf16 %v3518_v16, %v3516_v14 }
 0x5c1   :  { %v3522_v8 = vpop.eup %3521  ;;  %v1308_v9 = vadd.f32 %v1307_v5, %v1306_v3  ;;  %v1309_v11 = vsel %vm351_vm3, %v3520_v15, 0.0 }
 0x5c2   :  { %v3524_v10 = vpop.eup %3523  ;;  %3392 = vmatpush3.bf16.msra.mxu0 %v3391_v7  ;;  %v3394_v26 = vpack.c.bf16 %v3522_v8, %v3520_v15  ;;  %v1311_v32 = vsel %vm351_vm3, %v3522_v8, 0.0 }
 0x5c3   :  { %v3526_v27 = vpop.eup %3525  ;;  %v1310_v30 = vadd.f32 %v1309_v11, %v1308_v9  ;;  %3393 = vmatprep.subr.bf16.mxu0 %v3605_v28  ;;  %v1313_v13 = vsel %vm351_vm3, %v3524_v10, 0.0 }
 0x5c4   :  { %v3528_v31 = vpop.eup %3527  ;;  %v3397_v33 = vpack.c.bf16 %v3526_v27, %v3524_v10  ;;  %v1315_v19 = vsel %vm351_vm3, %v3526_v27, 0.0 }
 0x5c5   :  { %v3530_v4 = vpop.eup %3529  ;;  %v1312_v12 = vadd.f32 %v1311_v32, %v1310_v30  ;;  %v1317_v21 = vsel %vm351_vm3, %v3528_v31, 0.0 }
 0x5c6   :  { %3395 = vmatpush3.bf16.msra.mxu0 %v3394_v26  ;;  %v3400_v17 = vpack.c.bf16 %v3530_v4, %v3528_v31  ;;  %v1319_v23 = vsel %vm351_vm3, %v3530_v4, 0.0 }
 0x5c7   :  { %v1314_v18 = vadd.f32 %v1313_v13, %v1312_v12  ;;  %3396 = vmatprep.subr.bf16.mxu0 %v3605_v28 }
 0x5c9   :  { %v1316_v20 = vadd.f32 %v1315_v19, %v1314_v18 }
 0x5ca   :  { %3398 = vmatpush3.bf16.msra.mxu0 %v3397_v33 }
 0x5cb   :  { %v1318_v22 = vadd.f32 %v1317_v21, %v1316_v20  ;;  %3399 = vmatprep.subr.bf16.mxu0 %v3605_v28 }
 0x5cd   :  { %v1320_v24 = vadd.f32 %v1319_v23, %v1318_v22 }
 0x5ce   :  { %3401 = vmatpush3.bf16.msra.mxu0 %v3400_v17 }
 0x5cf   :  { %3214 = vmatprep.subr.mxu0 %v3905_v43  ;;  %v1321_v44 = vrot.slane %v1320_v24, 4 }
 0x5d1   :  { %3186 = vmatmul.mubr.msk.f32.vlgmr.msra.gmra.mrb[22].mxu0 %vm351_vm3, %v3779_v6  ;;  %v1494_v6 = vpop.f32.mrb[33].mxu1  ;;  %v1322_v45 = vadd.f32 %v1321_v44, %v1320_v24 }
 0x5d2   :  { %3215 = vmatpush3.msra.mxu0 %v3905_v43  ;;  %1837 = vxpose.xlu1.b32.start.end [1/1] (short) (narrow) %v1494_v6, 64  ;;  %v3207_v54 = vpop.f32.mrb[34].mxu1 }
 0x5d3   :  { %3410 = vmatprep.subr.bf16.mxu0 %v3605_v28  ;;  %v1323_v46 = vrot.slane %v1322_v45, 2  ;;  %2140 = vxpose.xlu0.b32.start.end [1/1] (short) (narrow) %v3207_v54, 64  ;;  %v3943_v55 = vpop.f32.mrb[35].mxu1 }
 0x5d5   :  { %v1324_v47 = vadd.f32 %v1323_v46, %v1322_v45 }
 0x5d7   :  { %v1325_v48 = vrot.slane %v1324_v47, 1 }
 0x5d9   :  { %v1326_v49 = vadd.f32 %v1325_v48, %v1324_v47 }
 0x5db   :  { %3531 = vrcp.f32 %v1326_v49 }
 0x5e5   :  { %v3532_v50 = vpop.eup %3531 }
 0x620   :  { %v1549_v25 = vpop.trf.xlu0 }
 0x621   :  { %3216 = vmatprep.mubr.msk.f32.mxu0 %vm221_vm1, %v1549_v25 }
 0x624   :  { %v1550_v35 = vpop.trf.xlu0 }
 0x625   :  { %3217 = vmatmul.mubr.msk.f32.vlgmr.msra.gmra.mrb[24].mxu0 %vm221_vm1, %v1550_v35 }
 0x628   :  { %v1551_v36 = vpop.trf.xlu0 }
 0x629   :  { %3219 = vmatprep.mubr.msk.f32.mxu0 %vm221_vm1, %v1551_v36 }
 0x62c   :  { %v1552_v39 = vpop.trf.xlu0 }
 0x62d   :  { %3220 = vmatmul.mubr.msk.f32.gmra.mrb[26].mxu0 %vm221_vm1, %v1552_v39 }
 0x630   :  { %v1553_v40 = vpop.trf.xlu0 }
 0x631   :  { %3222 = vmatprep.mubr.msk.f32.mxu0 %vm221_vm1, %v1553_v40 }
 0x634   :  { %v1554_v41 = vpop.trf.xlu0 }
 0x635   :  { %3223 = vmatmul.mubr.msk.f32.gmra.mrb[28].mxu0 %vm221_vm1, %v1554_v41 }
 0x638   :  { %v1555_v42 = vpop.trf.xlu0 }
 0x639   :  { %3225 = vmatprep.mubr.msk.f32.mxu0 %vm221_vm1, %v1555_v42 }
 0x63c   :  { %v1556_v43 = vpop.trf.xlu0 }
 0x63d   :  { %3226 = vmatmul.mubr.msk.f32.gmra.mrb[30].mxu0 %vm221_vm1, %v1556_v43 }
 0x63e   :  { %3244 = vmatprep.mubr.msk.f32.mxu0 %vm3606_vm2, %v3607_v29 }
 0x652   :  { %v1853_v39 = vpop.trf.xlu1 }
 0x656   :  { %v1854_v43 = vpop.trf.xlu1 }
 0x6a4   :  { %v1396_v51 = vpop.f32.mrb[22].mxu0 }
 0x6a5   :  { %v1401_v52 = vmul.f32 %v3532_v50, %v1396_v51  ;;  %v3187_v53 = vpop.f32.mrb[23].mxu0  ;;  %v1855_v50 = vpop.trf.xlu1 }
 0x6a7   :  { %1402 = vst.msk [vmem:[%s4089_s2 + $0x18] sm:$0xff] %vm351_vm3, %v1401_v52 }
 0x6f8   :  { %v3218_v56 = vpop.f32.mrb[24].mxu0 }
 0x6f9   :  { %v1655_v57 = vpop.f32.mrb[25].mxu0  ;;  %v1695_v61 = vsel %vm351_vm3, %v3218_v56, -inf }
 0x6fa   :  { %v1694_v0 = vsel %vm351_vm3, %v1655_v57, -inf }
 0x700   :  { %v3221_v58 = vpop.f32.mrb[26].mxu0 }
 0x701   :  { %v1665_v59 = vpop.f32.mrb[27].mxu0  ;;  %v1697_v15 = vsel %vm351_vm3, %v3221_v58, -inf }
 0x702   :  { %v1696_v8 = vsel %vm351_vm3, %v1665_v59, -inf }
 0x708   :  { %v3224_v60 = vpop.f32.mrb[28].mxu0 }
 0x709   :  { %v1700_v62 = vsel %vm351_vm3, %v3224_v60, -inf  ;;  %v1675_v63 = vpop.f32.mrb[29].mxu0 }
 0x70a   :  { %v1701_v1 = vmax.f32 %v1695_v61, %v1700_v62  ;;  %v1698_v2 = vsel %vm351_vm3, %v1675_v63, -inf }
 0x70b   :  { %v1699_v14 = vmax.f32 %v1694_v0, %v1698_v2  ;;  %v1856_v2 = vpop.trf.xlu1 }
 0x70d   :  { %v1706_v16 = vmax.f32 %v1699_v14, %v1701_v1 }
 0x710   :  { %v3227_v3 = vpop.f32.mrb[30].mxu0 }
 0x711   :  { %v1704_v5 = vsel %vm351_vm3, %v3227_v3, -inf  ;;  %v1685_v7 = vpop.f32.mrb[31].mxu0 }
 0x712   :  { %v1705_v9 = vmax.f32 %v1697_v15, %v1704_v5  ;;  %v1702_v10 = vsel %vm351_vm3, %v1685_v7, -inf }
 0x713   :  { %v1703_v11 = vmax.f32 %v1696_v8, %v1702_v10  ;;  %v1857_v8 = vpop.trf.xlu1 }
 0x715   :  { %v1707_v26 = vmax.f32 %v1703_v11, %v1705_v9 }
 0x717   :  { %v1708_v27 = vmax.f32 %v1706_v16, %v1707_v26  ;;  %v1858_v10 = vpop.trf.xlu1 }
 0x719   :  { %v1709_v30 = vrot.slane %v1708_v27, 4 }
 0x71b   :  { %v1710_v31 = vmax.f32 %v1708_v27, %v1709_v30  ;;  %v1859_v11 = vpop.trf.xlu1 }
 0x71d   :  { %v1711_v32 = vrot.slane %v1710_v31, 2 }
 0x71f   :  { %v1712_v33 = vmax.f32 %v1710_v31, %v1711_v32 }
 0x721   :  { %v1713_v4 = vrot.slane %v1712_v33, 1 }
 0x723   :  { %v1714_v12 = vmax.f32 %v1712_v33, %v1713_v4 }
 0x725   :  { %v1715_v13 = vsub.f32 %v1655_v57, %v1714_v12  ;;  %v1716_v17 = vsub.f32 %v3218_v56, %v1714_v12  ;;  %v1717_v18 = vsub.f32 %v1665_v59, %v1714_v12  ;;  %v1718_v19 = vsub.f32 %v3221_v58, %v1714_v12 }
 0x726   :  { %v1719_v20 = vsub.f32 %v1675_v63, %v1714_v12  ;;  %v1720_v21 = vsub.f32 %v3224_v60, %v1714_v12  ;;  %v1721_v22 = vsub.f32 %v1685_v7, %v1714_v12  ;;  %v1722_v23 = vsub.f32 %v3227_v3, %v1714_v12 }
 0x727   :  { %v1723_v24 = vmul.f32 1.442695, %v1715_v13  ;;  %v1725_v25 = vmul.f32 1.442695, %v1716_v17  ;;  %v1727_v35 = vmul.f32 1.442695, %v1717_v18 }
 0x728   :  { %v1729_v36 = vmul.f32 1.442695, %v1718_v19  ;;  %v1731_v6 = vmul.f32 1.442695, %v1719_v20  ;;  %v1733_v40 = vmul.f32 1.442695, %v1720_v21 }
 0x729   :  { %3533 = vpow2.f32 %v1723_v24  ;;  %v1735_v41 = vmul.f32 1.442695, %v1721_v22  ;;  %v1737_v42 = vmul.f32 1.442695, %v1722_v23 }
 0x72a   :  { %3535 = vpow2.f32 %v1725_v25 }
 0x72b   :  { %3537 = vpow2.f32 %v1727_v35 }
 0x72c   :  { %3539 = vpow2.f32 %v1729_v36 }
 0x72d   :  { %3541 = vpow2.f32 %v1731_v6 }
 0x72e   :  { %3543 = vpow2.f32 %v1733_v40 }
 0x72f   :  { %3545 = vpow2.f32 %v1735_v41 }
 0x730   :  { %3547 = vpow2.f32 %v1737_v42 }
 0x733   :  { %v3534_v44 = vpop.eup %3533 }
 0x734   :  { %v3536_v45 = vpop.eup %3535  ;;  %v1739_v46 = vsel %vm351_vm3, %v3534_v44, 0.0 }
 0x735   :  { %v3538_v47 = vpop.eup %3537  ;;  %v1740_v48 = vsel %vm351_vm3, %v3536_v45, 0.0  ;;  %v3411_v49 = vpack.c.bf16 %v3536_v45, %v3534_v44 }
 0x736   :  { %v3540_v51 = vpop.eup %3539  ;;  %v1741_v52 = vadd.f32 %v1740_v48, %v1739_v46  ;;  %v1742_v54 = vsel %vm351_vm3, %v3538_v47, 0.0 }
 0x737   :  { %v3542_v53 = vpop.eup %3541  ;;  %3412 = vmatpush3.bf16.msra.mxu0 %v3411_v49  ;;  %v3414_v56 = vpack.c.bf16 %v3540_v51, %v3538_v47  ;;  %v1744_v60 = vsel %vm351_vm3, %v3540_v51, 0.0 }
 0x738   :  { %v3544_v57 = vpop.eup %3543  ;;  %v1743_v58 = vadd.f32 %v1742_v54, %v1741_v52  ;;  %3413 = vmatprep.subr.bf16.mxu0 %v3605_v28  ;;  %v1746_v0 = vsel %vm351_vm3, %v3542_v53, 0.0 }
 0x739   :  { %v3546_v59 = vpop.eup %3545  ;;  %v3417_v61 = vpack.c.bf16 %v3544_v57, %v3542_v53  ;;  %v1748_v16 = vsel %vm351_vm3, %v3544_v57, 0.0 }
 0x73a   :  { %v3548_v62 = vpop.eup %3547  ;;  %v1745_v63 = vadd.f32 %v1744_v60, %v1743_v58  ;;  %v1750_v15 = vsel %vm351_vm3, %v3546_v59, 0.0 }
 0x73b   :  { %3415 = vmatpush3.bf16.msra.mxu0 %v3414_v56  ;;  %v3420_v1 = vpack.c.bf16 %v3548_v62, %v3546_v59  ;;  %v1752_v7 = vsel %vm351_vm3, %v3548_v62, 0.0 }
 0x73c   :  { %v1747_v14 = vadd.f32 %v1746_v0, %v1745_v63  ;;  %3416 = vmatprep.subr.bf16.mxu0 %v3605_v28 }
 0x73e   :  { %v1749_v3 = vadd.f32 %v1748_v16, %v1747_v14 }
 0x73f   :  { %3418 = vmatpush3.bf16.msra.mxu0 %v3417_v61 }
 0x740   :  { %v1751_v5 = vadd.f32 %v1750_v15, %v1749_v3  ;;  %3419 = vmatprep.subr.bf16.mxu0 %v3605_v28 }
 0x742   :  { %v1753_v9 = vadd.f32 %v1752_v7, %v1751_v5 }
 0x743   :  { %3421 = vmatpush3.bf16.msra.mxu0 %v3420_v1 }
 0x744   :  { %3247 = vmatprep.subr.mxu0 %v3925_v34  ;;  %v1754_v31 = vrot.slane %v1753_v9, 4 }
 0x746   :  { %3245 = vmatmul.mubr.msk.f32.vlgmr.msra.gmra.mrb[32].mxu0 %vm351_vm3, %v3927_v37  ;;  %v1860_v37 = vpop.trf.xlu1  ;;  %v1755_v32 = vadd.f32 %v1754_v31, %v1753_v9  ;;  %v2156_v9 = vpop.trf.xlu0 }
 0x747   :  { %3248 = vmatpush3.msra.mxu0 %v3925_v34  ;;  %3249 = vmatprep.mubr.msk.f32.mxu0 %vm221_vm1, %v1853_v39  ;;  %v3979_v34 = vpop.f32.mrb[36].mxu1 }
 0x748   :  { %3434 = vmatprep.subr.bf16.mxu0 %v3605_v28  ;;  %v3981_v26 = vpop.f32.mrb[37].mxu1  ;;  %v1756_v33 = vrot.slane %v1755_v32, 2 }
 0x749   :  { %v3983_v27 = vpop.f32.mrb[38].mxu1 }
 0x74a   :  { %3250 = vmatmul.mubr.msk.f32.vlgmr.msra.gmra.mrb[34].mxu0 %vm221_vm1, %v1854_v43  ;;  %v1524_v30 = vpop.f32.mrb[39].mxu1  ;;  %v1757_v4 = vadd.f32 %v1756_v33, %v1755_v32 }
 0x74b   :  { %3252 = vmatprep.mubr.msk.f32.mxu0 %vm221_vm1, %v1855_v50  ;;  %2443 = vxpose.xlu1.b32.start.end [1/1] (short) (narrow) %v1524_v30, 64  ;;  %v2157_v30 = vpop.trf.xlu0 }
 0x74c   :  { %v1758_v12 = vrot.slane %v1757_v4, 1 }
 0x74e   :  { %3253 = vmatmul.mubr.msk.f32.gmra.mrb[36].mxu0 %vm221_vm1, %v1856_v2  ;;  %v1759_v13 = vadd.f32 %v1758_v12, %v1757_v4 }
 0x74f   :  { %3255 = vmatprep.mubr.msk.f32.mxu0 %vm221_vm1, %v1857_v8 }
 0x750   :  { %3549 = vrcp.f32 %v1759_v13 }
 0x752   :  { %3256 = vmatmul.mubr.msk.f32.gmra.mrb[38].mxu0 %vm221_vm1, %v1858_v10 }
 0x753   :  { %3258 = vmatprep.mubr.msk.f32.mxu0 %vm221_vm1, %v1859_v11 }
 0x756   :  { %3259 = vmatmul.mubr.msk.f32.gmra.mrb[40].mxu0 %vm221_vm1, %v1860_v37 }
 0x757   :  { %3310 = vmatprep.mubr.msk.f32.mxu0 %vm3606_vm2, %v3607_v29 }
 0x75a   :  { %v3550_v17 = vpop.eup %3549 }
 0x819   :  { %v1829_v18 = vpop.f32.mrb[32].mxu0 }
 0x81a   :  { %v1834_v19 = vmul.f32 %v3550_v17, %v1829_v18  ;;  %v3246_v20 = vpop.f32.mrb[33].mxu0  ;;  %v2158_v17 = vpop.trf.xlu0 }
 0x81c   :  { %2823 = vst.msk [vmem:[%s4089_s2 + $0x20] sm:$0xff] %vm351_vm3, %v1834_v19 }
 0x81d   :  { %v3251_v21 = vpop.f32.mrb[34].mxu0 }
 0x81e   :  { %v1959_v22 = vpop.f32.mrb[35].mxu0  ;;  %v1999_v35 = vsel %vm351_vm3, %v3251_v21, -inf }
 0x81f   :  { %v1998_v39 = vsel %vm351_vm3, %v1959_v22, -inf }
 0x821   :  { %v3254_v23 = vpop.f32.mrb[36].mxu0 }
 0x822   :  { %v1969_v24 = vpop.f32.mrb[37].mxu0  ;;  %v2001_v44 = vsel %vm351_vm3, %v3254_v23, -inf }
 0x823   :  { %v2000_v48 = vsel %vm351_vm3, %v1969_v24, -inf }
 0x825   :  { %v3257_v25 = vpop.f32.mrb[38].mxu0 }
 0x826   :  { %v2004_v36 = vsel %vm351_vm3, %v3257_v25, -inf  ;;  %v1979_v6 = vpop.f32.mrb[39].mxu0 }
 0x827   :  { %v2005_v40 = vmax.f32 %v1999_v35, %v2004_v36  ;;  %v2002_v41 = vsel %vm351_vm3, %v1979_v6, -inf }
 0x828   :  { %v2003_v42 = vmax.f32 %v1998_v39, %v2002_v41 }
 0x829   :  { %v3260_v43 = vpop.f32.mrb[40].mxu0 }
 0x82a   :  { %v2010_v45 = vmax.f32 %v2003_v42, %v2005_v40  ;;  %v2008_v46 = vsel %vm351_vm3, %v3260_v43, -inf  ;;  %v1989_v47 = vpop.f32.mrb[41].mxu0  ;;  %v2159_v42 = vpop.trf.xlu0 }
 0x82b   :  { %v2009_v49 = vmax.f32 %v2001_v44, %v2008_v46  ;;  %v2006_v50 = vsel %vm351_vm3, %v1989_v47, -inf }
 0x82c   :  { %v2007_v51 = vmax.f32 %v2000_v48, %v2006_v50 }
 0x82e   :  { %v2011_v52 = vmax.f32 %v2007_v51, %v2009_v49  ;;  %v2160_v49 = vpop.trf.xlu0 }
 0x830   :  { %v2012_v53 = vmax.f32 %v2010_v45, %v2011_v52 }
 0x832   :  { %v2013_v54 = vrot.slane %v2012_v53, 4  ;;  %v2161_v51 = vpop.trf.xlu0 }
 0x834   :  { %v2014_v56 = vmax.f32 %v2012_v53, %v2013_v54 }
 0x836   :  { %v2015_v57 = vrot.slane %v2014_v56, 2  ;;  %v2162_v52 = vpop.trf.xlu0 }
 0x838   :  { %v2016_v58 = vmax.f32 %v2014_v56, %v2015_v57 }
 0x83a   :  { %v2017_v59 = vrot.slane %v2016_v58, 1  ;;  %v2163_v53 = vpop.trf.xlu0 }
 0x83c   :  { %v2018_v60 = vmax.f32 %v2016_v58, %v2017_v59 }
 0x83e   :  { %v2019_v61 = vsub.f32 %v1959_v22, %v2018_v60  ;;  %v2020_v62 = vsub.f32 %v3251_v21, %v2018_v60  ;;  %v2021_v63 = vsub.f32 %v1969_v24, %v2018_v60  ;;  %v2022_v0 = vsub.f32 %v3254_v23, %v2018_v60 }
 0x83f   :  { %v2023_v1 = vsub.f32 %v1979_v6, %v2018_v60  ;;  %v2024_v2 = vsub.f32 %v3257_v25, %v2018_v60  ;;  %v2025_v14 = vsub.f32 %v1989_v47, %v2018_v60  ;;  %v2026_v16 = vsub.f32 %v3260_v43, %v2018_v60 }
 0x840   :  { %v2027_v3 = vmul.f32 1.442695, %v2019_v61  ;;  %v2029_v15 = vmul.f32 1.442695, %v2020_v62  ;;  %v2031_v5 = vmul.f32 1.442695, %v2021_v63 }
 0x841   :  { %v2033_v7 = vmul.f32 1.442695, %v2022_v0  ;;  %v2035_v8 = vmul.f32 1.442695, %v2023_v1  ;;  %v2037_v10 = vmul.f32 1.442695, %v2024_v2 }
 0x842   :  { %3551 = vpow2.f32 %v2027_v3  ;;  %v2039_v11 = vmul.f32 1.442695, %v2025_v14  ;;  %v2041_v37 = vmul.f32 1.442695, %v2026_v16 }
 0x843   :  { %3553 = vpow2.f32 %v2029_v15 }
 0x844   :  { %3555 = vpow2.f32 %v2031_v5 }
 0x845   :  { %3557 = vpow2.f32 %v2033_v7 }
 0x846   :  { %3559 = vpow2.f32 %v2035_v8 }
 0x847   :  { %3561 = vpow2.f32 %v2037_v10 }
 0x848   :  { %3563 = vpow2.f32 %v2039_v11 }
 0x849   :  { %3565 = vpow2.f32 %v2041_v37 }
 0x84c   :  { %v3552_v31 = vpop.eup %3551 }
 0x84d   :  { %v3554_v32 = vpop.eup %3553  ;;  %v2043_v33 = vsel %vm351_vm3, %v3552_v31, 0.0 }
 0x84e   :  { %v3556_v4 = vpop.eup %3555  ;;  %v2044_v12 = vsel %vm351_vm3, %v3554_v32, 0.0  ;;  %v3423_v13 = vpack.c.bf16 %v3554_v32, %v3552_v31 }
 0x84f   :  { %v3558_v18 = vpop.eup %3557  ;;  %v2045_v19 = vadd.f32 %v2044_v12, %v2043_v33  ;;  %v2046_v21 = vsel %vm351_vm3, %v3556_v4, 0.0 }
 0x850   :  { %v3560_v20 = vpop.eup %3559  ;;  %3424 = vmatpush3.bf16.msra.mxu1 %v3423_v13  ;;  %v3426_v22 = vpack.c.bf16 %v3558_v18, %v3556_v4  ;;  %v2048_v35 = vsel %vm351_vm3, %v3558_v18, 0.0 }
 0x851   :  { %v3562_v23 = vpop.eup %3561  ;;  %v2047_v24 = vadd.f32 %v2046_v21, %v2045_v19  ;;  %3425 = vmatprep.subr.bf16.mxu1 %v3605_v28  ;;  %v2050_v40 = vsel %vm351_vm3, %v3560_v20, 0.0 }
 0x852   :  { %v3564_v25 = vpop.eup %3563  ;;  %v3429_v36 = vpack.c.bf16 %v3562_v23, %v3560_v20  ;;  %v2052_v44 = vsel %vm351_vm3, %v3562_v23, 0.0 }
 0x853   :  { %v3566_v6 = vpop.eup %3565  ;;  %v2049_v39 = vadd.f32 %v2048_v35, %v2047_v24  ;;  %v2054_v46 = vsel %vm351_vm3, %v3564_v25, 0.0 }
 0x854   :  { %3427 = vmatpush3.bf16.msra.mxu1 %v3426_v22  ;;  %v3432_v41 = vpack.c.bf16 %v3566_v6, %v3564_v25  ;;  %v2056_v48 = vsel %vm351_vm3, %v3566_v6, 0.0 }
 0x855   :  { %v2051_v43 = vadd.f32 %v2050_v40, %v2049_v39  ;;  %3428 = vmatprep.subr.bf16.mxu1 %v3605_v28 }
 0x857   :  { %v2053_v45 = vadd.f32 %v2052_v44, %v2051_v43 }
 0x858   :  { %3430 = vmatpush3.bf16.msra.mxu1 %v3429_v36 }
 0x859   :  { %v2055_v47 = vadd.f32 %v2054_v46, %v2053_v45  ;;  %3431 = vmatprep.subr.bf16.mxu1 %v3605_v28  ;;  %v2459_v46 = vpop.trf.xlu1 }
 0x85b   :  { %v2057_v50 = vadd.f32 %v2056_v48, %v2055_v47 }
 0x85c   :  { %3433 = vmatpush3.bf16.msra.mxu1 %v3432_v41 }
 0x85d   :  { %3280 = vmatprep.subr.mxu1 %v3943_v55 }
 0x85f   :  { %3278 = vmatmul.mubr.msk.f32.vlgmr.msra.gmra.mrb[40].mxu1 %vm351_vm3, %v3930_v38  ;;  %v2058_v38 = vrot.slane %v2057_v50, 4 }
 0x860   :  { %3281 = vmatpush3.msra.mxu1 %v3943_v55  ;;  %3282 = vmatprep.mubr.msk.f32.mxu1 %vm221_vm1, %v2156_v9 }
 0x861   :  { %3446 = vmatprep.subr.bf16.mxu1 %v3605_v28  ;;  %v2059_v55 = vadd.f32 %v2058_v38, %v2057_v50  ;;  %v2460_v50 = vpop.trf.xlu1 }
 0x863   :  { %3283 = vmatmul.mubr.msk.f32.vlgmr.msra.gmra.mrb[42].mxu1 %vm221_vm1, %v2157_v30  ;;  %v2060_v54 = vrot.slane %v2059_v55, 2 }
 0x864   :  { %3285 = vmatprep.mubr.msk.f32.mxu1 %vm221_vm1, %v2158_v17 }
 0x865   :  { %v2061_v56 = vadd.f32 %v2060_v54, %v2059_v55 }
 0x867   :  { %3286 = vmatmul.mubr.msk.f32.gmra.mrb[44].mxu1 %vm221_vm1, %v2159_v42  ;;  %v2062_v57 = vrot.slane %v2061_v56, 1 }
 0x868   :  { %3288 = vmatprep.mubr.msk.f32.mxu1 %vm221_vm1, %v2160_v49 }
 0x869   :  { %v2063_v58 = vadd.f32 %v2062_v57, %v2061_v56  ;;  %v2461_v56 = vpop.trf.xlu1 }
 0x86b   :  { %3289 = vmatmul.mubr.msk.f32.gmra.mrb[46].mxu1 %vm221_vm1, %v2161_v51  ;;  %3567 = vrcp.f32 %v2063_v58 }
 0x86c   :  { %3291 = vmatprep.mubr.msk.f32.mxu1 %vm221_vm1, %v2162_v52 }
 0x86f   :  { %3292 = vmatmul.mubr.msk.f32.gmra.mrb[48].mxu1 %vm221_vm1, %v2163_v53 }
 0x870   :  { %3343 = vmatprep.mubr.msk.f32.mxu1 %vm3606_vm2, %v3607_v29 }
 0x875   :  { %v3568_v59 = vpop.eup %3567 }
 0x932   :  { %v2133_v60 = vpop.f32.mrb[40].mxu1 }
 0x933   :  { %v2138_v61 = vmul.f32 %v3568_v59, %v2133_v60  ;;  %v3279_v62 = vpop.f32.mrb[41].mxu1 }
 0x935   :  { %2833 = vst.msk [vmem:[%s4089_s2 + $0x28] sm:$0xff] %vm351_vm3, %v2138_v61 }
 0x936   :  { %v3284_v63 = vpop.f32.mrb[42].mxu1 }
 0x937   :  { %v2262_v0 = vpop.f32.mrb[43].mxu1  ;;  %v2302_v14 = vsel %vm351_vm3, %v3284_v63, -inf }
 0x938   :  { %v2301_v15 = vsel %vm351_vm3, %v2262_v0, -inf }
 0x93a   :  { %v3287_v1 = vpop.f32.mrb[44].mxu1 }
 0x93b   :  { %v2272_v29 = vpop.f32.mrb[45].mxu1  ;;  %v2304_v10 = vsel %vm351_vm3, %v3287_v1, -inf }
 0x93c   :  { %v2303_v31 = vsel %vm351_vm3, %v2272_v29, -inf }
 0x93e   :  { %v3290_v2 = vpop.f32.mrb[46].mxu1 }
 0x93f   :  { %v2307_v16 = vsel %vm351_vm3, %v3290_v2, -inf  ;;  %v2282_v3 = vpop.f32.mrb[47].mxu1 }
 0x940   :  { %v2308_v5 = vmax.f32 %v2302_v14, %v2307_v16  ;;  %v2305_v7 = vsel %vm351_vm3, %v2282_v3, -inf }
 0x941   :  { %v2306_v8 = vmax.f32 %v2301_v15, %v2305_v7  ;;  %v2462_v15 = vpop.trf.xlu1 }
 0x942   :  { %v3293_v9 = vpop.f32.mrb[48].mxu1 }
 0x943   :  { %v2313_v11 = vmax.f32 %v2306_v8, %v2308_v5  ;;  %v2311_v37 = vsel %vm351_vm3, %v3293_v9, -inf  ;;  %v2292_v30 = vpop.f32.mrb[49].mxu1 }
 0x944   :  { %v2312_v32 = vmax.f32 %v2304_v10, %v2311_v37  ;;  %v2309_v33 = vsel %vm351_vm3, %v2292_v30, -inf }
 0x945   :  { %v2310_v4 = vmax.f32 %v2303_v31, %v2309_v33  ;;  %v2463_v37 = vpop.trf.xlu1 }
 0x947   :  { %v2314_v12 = vmax.f32 %v2310_v4, %v2312_v32 }
 0x949   :  { %v2315_v13 = vmax.f32 %v2313_v11, %v2314_v12  ;;  %v2464_v31 = vpop.trf.xlu1 }
 0x94b   :  { %v2316_v17 = vrot.slane %v2315_v13, 4 }
 0x94d   :  { %v2317_v18 = vmax.f32 %v2315_v13, %v2316_v17  ;;  %v2465_v32 = vpop.trf.xlu1 }
 0x94f   :  { %v2318_v19 = vrot.slane %v2317_v18, 2 }
 0x951   :  { %v2319_v20 = vmax.f32 %v2317_v18, %v2318_v19  ;;  %v2466_v33 = vpop.trf.xlu1 }
 0x953   :  { %v2320_v21 = vrot.slane %v2319_v20, 1 }
 0x955   :  { %v2321_v22 = vmax.f32 %v2319_v20, %v2320_v21 }
 0x957   :  { %v2322_v23 = vsub.f32 %v2262_v0, %v2321_v22  ;;  %v2323_v24 = vsub.f32 %v3284_v63, %v2321_v22  ;;  %v2324_v25 = vsub.f32 %v2272_v29, %v2321_v22  ;;  %v2325_v35 = vsub.f32 %v3287_v1, %v2321_v22 }
 0x958   :  { %v2326_v36 = vsub.f32 %v2282_v3, %v2321_v22  ;;  %v2327_v6 = vsub.f32 %v3290_v2, %v2321_v22  ;;  %v2328_v39 = vsub.f32 %v2292_v30, %v2321_v22  ;;  %v2329_v40 = vsub.f32 %v3293_v9, %v2321_v22 }
 0x959   :  { %v2330_v41 = vmul.f32 1.442695, %v2322_v23  ;;  %v2332_v42 = vmul.f32 1.442695, %v2323_v24  ;;  %v2334_v43 = vmul.f32 1.442695, %v2324_v25 }
 0x95a   :  { %v2336_v44 = vmul.f32 1.442695, %v2325_v35  ;;  %v2338_v45 = vmul.f32 1.442695, %v2326_v36  ;;  %v2340_v47 = vmul.f32 1.442695, %v2327_v6 }
 0x95b   :  { %3569 = vpow2.f32 %v2330_v41  ;;  %v2342_v48 = vmul.f32 1.442695, %v2328_v39  ;;  %v2344_v49 = vmul.f32 1.442695, %v2329_v40 }
 0x95c   :  { %3571 = vpow2.f32 %v2332_v42 }
 0x95d   :  { %3573 = vpow2.f32 %v2334_v43 }
 0x95e   :  { %3575 = vpow2.f32 %v2336_v44 }
 0x95f   :  { %3577 = vpow2.f32 %v2338_v45 }
 0x960   :  { %3579 = vpow2.f32 %v2340_v47 }
 0x961   :  { %3581 = vpow2.f32 %v2342_v48 }
 0x962   :  { %3583 = vpow2.f32 %v2344_v49 }
 0x965   :  { %v3570_v51 = vpop.eup %3569 }
 0x966   :  { %v3572_v52 = vpop.eup %3571  ;;  %v2346_v53 = vsel %vm351_vm3, %v3570_v51, 0.0 }
 0x967   :  { %v3574_v38 = vpop.eup %3573  ;;  %v2347_v55 = vsel %vm351_vm3, %v3572_v52, 0.0  ;;  %v3435_v54 = vpack.c.bf16 %v3572_v52, %v3570_v51 }
 0x968   :  { %v3576_v57 = vpop.eup %3575  ;;  %v2348_v58 = vadd.f32 %v2347_v55, %v2346_v53  ;;  %v2349_v60 = vsel %vm351_vm3, %v3574_v38, 0.0 }
 0x969   :  { %v3578_v59 = vpop.eup %3577  ;;  %3436 = vmatpush3.bf16.msra.mxu0 %v3435_v54  ;;  %v3438_v61 = vpack.c.bf16 %v3576_v57, %v3574_v38  ;;  %v2351_v1 = vsel %vm351_vm3, %v3576_v57, 0.0 }
 0x96a   :  { %v3580_v62 = vpop.eup %3579  ;;  %v2350_v63 = vadd.f32 %v2349_v60, %v2348_v58  ;;  %3437 = vmatprep.subr.bf16.mxu0 %v3605_v28  ;;  %v2353_v16 = vsel %vm351_vm3, %v3578_v59, 0.0 }
 0x96b   :  { %v3582_v0 = vpop.eup %3581  ;;  %v3441_v29 = vpack.c.bf16 %v3580_v62, %v3578_v59  ;;  %v2355_v7 = vsel %vm351_vm3, %v3580_v62, 0.0 }
 0x96c   :  { %v3584_v2 = vpop.eup %3583  ;;  %v2352_v14 = vadd.f32 %v2351_v1, %v2350_v63  ;;  %v2357_v9 = vsel %vm351_vm3, %v3582_v0, 0.0 }
 0x96d   :  { %3439 = vmatpush3.bf16.msra.mxu0 %v3438_v61  ;;  %v3444_v3 = vpack.c.bf16 %v3584_v2, %v3582_v0  ;;  %v2359_v11 = vsel %vm351_vm3, %v3584_v2, 0.0 }
 0x96e   :  { %v2354_v5 = vadd.f32 %v2353_v16, %v2352_v14  ;;  %3440 = vmatprep.subr.bf16.mxu0 %v3605_v28 }
 0x970   :  { %v2356_v8 = vadd.f32 %v2355_v7, %v2354_v5 }
 0x971   :  { %3442 = vmatpush3.bf16.msra.mxu0 %v3441_v29 }
 0x972   :  { %v2358_v10 = vadd.f32 %v2357_v9, %v2356_v8  ;;  %3443 = vmatprep.subr.bf16.mxu0 %v3605_v28 }
 0x974   :  { %v2360_v30 = vadd.f32 %v2359_v11, %v2358_v10 }
 0x975   :  { %3445 = vmatpush3.bf16.msra.mxu0 %v3444_v3 }
 0x976   :  { %3313 = vmatprep.subr.mxu0 %v3979_v34 }
 0x978   :  { %3311 = vmatmul.mubr.msk.f32.vlgmr.msra.gmra.mrb[42].mxu0 %vm351_vm3, %v3981_v26 }
 0x979   :  { %3314 = vmatpush3.msra.mxu0 %v3979_v34  ;;  %3315 = vmatprep.mubr.msk.f32.mxu0 %vm221_vm1, %v2459_v46  ;;  %v2361_v34 = vrot.slane %v2360_v30, 4 }
 0x97b   :  { %v2362_v26 = vadd.f32 %v2361_v34, %v2360_v30 }
 0x97c   :  { %3316 = vmatmul.mubr.msk.f32.vlgmr.msra.gmra.mrb[44].mxu0 %vm221_vm1, %v2460_v50 }
 0x97d   :  { %3318 = vmatprep.mubr.msk.f32.mxu0 %vm221_vm1, %v2461_v56  ;;  %v2363_v4 = vrot.slane %v2362_v26, 2 }
 0x97f   :  { %v2364_v12 = vadd.f32 %v2363_v4, %v2362_v26 }
 0x980   :  { %3319 = vmatmul.mubr.msk.f32.gmra.mrb[46].mxu0 %vm221_vm1, %v2462_v15 }
 0x981   :  { %3321 = vmatprep.mubr.msk.f32.mxu0 %vm221_vm1, %v2463_v37  ;;  %v2365_v13 = vrot.slane %v2364_v12, 1 }
 0x983   :  { %v2366_v17 = vadd.f32 %v2365_v13, %v2364_v12 }
 0x984   :  { %3322 = vmatmul.mubr.msk.f32.gmra.mrb[48].mxu0 %vm221_vm1, %v2464_v31 }
 0x985   :  { %3324 = vmatprep.mubr.msk.f32.mxu0 %vm221_vm1, %v2465_v32  ;;  %3585 = vrcp.f32 %v2366_v17 }
 0x988   :  { %3325 = vmatmul.mubr.msk.f32.gmra.mrb[50].mxu0 %vm221_vm1, %v2466_v33 }
 0x98f   :  { %v3586_v18 = vpop.eup %3585 }
 0xa4b   :  { %v2436_v19 = vpop.f32.mrb[42].mxu0 }
 0xa4c   :  { %v2441_v20 = vmul.f32 %v3586_v18, %v2436_v19  ;;  %v3312_v21 = vpop.f32.mrb[43].mxu0 }
 0xa4e   :  { %2843 = vst.msk [vmem:[%s4089_s2 + $0x30] sm:$0xff] %vm351_vm3, %v2441_v20 }
 0xa4f   :  { %v3317_v22 = vpop.f32.mrb[44].mxu0 }
 0xa50   :  { %v2565_v23 = vpop.f32.mrb[45].mxu0  ;;  %v2605_v36 = vsel %vm351_vm3, %v3317_v22, -inf }
 0xa51   :  { %v2604_v40 = vsel %vm351_vm3, %v2565_v23, -inf }
 0xa53   :  { %v3320_v24 = vpop.f32.mrb[46].mxu0 }
 0xa54   :  { %v2575_v25 = vpop.f32.mrb[47].mxu0  ;;  %v2607_v45 = vsel %vm351_vm3, %v3320_v24, -inf }
 0xa55   :  { %v2606_v49 = vsel %vm351_vm3, %v2575_v25, -inf }
 0xa57   :  { %v3323_v35 = vpop.f32.mrb[48].mxu0 }
 0xa58   :  { %v2610_v6 = vsel %vm351_vm3, %v3323_v35, -inf  ;;  %v2585_v39 = vpop.f32.mrb[49].mxu0 }
 0xa59   :  { %v2611_v41 = vmax.f32 %v2605_v36, %v2610_v6  ;;  %v2608_v42 = vsel %vm351_vm3, %v2585_v39, -inf }
 0xa5a   :  { %v2609_v43 = vmax.f32 %v2604_v40, %v2608_v42 }
 0xa5b   :  { %v3326_v44 = vpop.f32.mrb[50].mxu0 }
 0xa5c   :  { %v2616_v46 = vmax.f32 %v2609_v43, %v2611_v41  ;;  %v2614_v47 = vsel %vm351_vm3, %v3326_v44, -inf  ;;  %v2595_v48 = vpop.f32.mrb[51].mxu0 }
 0xa5d   :  { %v2615_v50 = vmax.f32 %v2607_v45, %v2614_v47  ;;  %v2612_v51 = vsel %vm351_vm3, %v2595_v48, -inf }
 0xa5e   :  { %v2613_v52 = vmax.f32 %v2606_v49, %v2612_v51 }
 0xa60   :  { %v2617_v53 = vmax.f32 %v2613_v52, %v2615_v50 }
 0xa62   :  { %v2618_v38 = vmax.f32 %v2616_v46, %v2617_v53 }
 0xa64   :  { %v2619_v55 = vrot.slane %v2618_v38, 4 }
 0xa66   :  { %v2620_v54 = vmax.f32 %v2618_v38, %v2619_v55 }
 0xa68   :  { %v2621_v56 = vrot.slane %v2620_v54, 2 }
 0xa6a   :  { %v2622_v57 = vmax.f32 %v2620_v54, %v2621_v56 }
 0xa6c   :  { %v2623_v58 = vrot.slane %v2622_v57, 1 }
 0xa6e   :  { %v2624_v59 = vmax.f32 %v2622_v57, %v2623_v58 }
 0xa70   :  { %v2625_v60 = vsub.f32 %v2565_v23, %v2624_v59  ;;  %v2626_v61 = vsub.f32 %v3317_v22, %v2624_v59  ;;  %v2627_v62 = vsub.f32 %v2575_v25, %v2624_v59  ;;  %v2628_v63 = vsub.f32 %v3320_v24, %v2624_v59 }
 0xa71   :  { %v2629_v0 = vsub.f32 %v2585_v39, %v2624_v59  ;;  %v2630_v1 = vsub.f32 %v3323_v35, %v2624_v59  ;;  %v2631_v29 = vsub.f32 %v2595_v48, %v2624_v59  ;;  %v2632_v2 = vsub.f32 %v3326_v44, %v2624_v59 }
 0xa72   :  { %v2633_v14 = vmul.f32 1.442695, %v2625_v60  ;;  %v2635_v16 = vmul.f32 1.442695, %v2626_v61  ;;  %v2637_v3 = vmul.f32 1.442695, %v2627_v62 }
 0xa73   :  { %v2639_v15 = vmul.f32 1.442695, %v2628_v63  ;;  %v2641_v5 = vmul.f32 1.442695, %v2629_v0  ;;  %v2643_v7 = vmul.f32 1.442695, %v2630_v1 }
 0xa74   :  { %3587 = vpow2.f32 %v2633_v14  ;;  %v2645_v8 = vmul.f32 1.442695, %v2631_v29  ;;  %v2647_v9 = vmul.f32 1.442695, %v2632_v2 }
 0xa75   :  { %3589 = vpow2.f32 %v2635_v16 }
 0xa76   :  { %3591 = vpow2.f32 %v2637_v3 }
 0xa77   :  { %3593 = vpow2.f32 %v2639_v15 }
 0xa78   :  { %3595 = vpow2.f32 %v2641_v5 }
 0xa79   :  { %3597 = vpow2.f32 %v2643_v7 }
 0xa7a   :  { %3599 = vpow2.f32 %v2645_v8 }
 0xa7b   :  { %3601 = vpow2.f32 %v2647_v9 }
 0xa7e   :  { %v3588_v10 = vpop.eup %3587 }
 0xa7f   :  { %v3590_v11 = vpop.eup %3589  ;;  %v2649_v37 = vsel %vm351_vm3, %v3588_v10, 0.0 }
 0xa80   :  { %v3592_v30 = vpop.eup %3591  ;;  %v2650_v31 = vsel %vm351_vm3, %v3590_v11, 0.0  ;;  %v3447_v32 = vpack.c.bf16 %v3590_v11, %v3588_v10 }
 0xa81   :  { %v3594_v33 = vpop.eup %3593  ;;  %v2651_v34 = vadd.f32 %v2650_v31, %v2649_v37  ;;  %v2652_v4 = vsel %vm351_vm3, %v3592_v30, 0.0 }
 0xa82   :  { %v3596_v26 = vpop.eup %3595  ;;  %3448 = vmatpush3.bf16.msra.mxu1 %v3447_v32  ;;  %v3450_v12 = vpack.c.bf16 %v3594_v33, %v3592_v30  ;;  %v2654_v19 = vsel %vm351_vm3, %v3594_v33, 0.0 }
 0xa83   :  { %v3598_v13 = vpop.eup %3597  ;;  %v2653_v17 = vadd.f32 %v2652_v4, %v2651_v34  ;;  %3449 = vmatprep.subr.bf16.mxu1 %v3605_v28  ;;  %v2656_v23 = vsel %vm351_vm3, %v3596_v26, 0.0 }
 0xa84   :  { %v3600_v18 = vpop.eup %3599  ;;  %v3453_v20 = vpack.c.bf16 %v3598_v13, %v3596_v26  ;;  %v2658_v35 = vsel %vm351_vm3, %v3598_v13, 0.0 }
 0xa85   :  { %v3602_v21 = vpop.eup %3601  ;;  %v2655_v22 = vadd.f32 %v2654_v19, %v2653_v17  ;;  %v2660_v6 = vsel %vm351_vm3, %v3600_v18, 0.0 }
 0xa86   :  { %3451 = vmatpush3.bf16.msra.mxu1 %v3450_v12  ;;  %v3456_v24 = vpack.c.bf16 %v3602_v21, %v3600_v18  ;;  %v2662_v40 = vsel %vm351_vm3, %v3602_v21, 0.0 }
 0xa87   :  { %v2657_v25 = vadd.f32 %v2656_v23, %v2655_v22  ;;  %3452 = vmatprep.subr.bf16.mxu1 %v3605_v28 }
 0xa89   :  { %v2659_v36 = vadd.f32 %v2658_v35, %v2657_v25 }
 0xa8a   :  { %3454 = vmatpush3.bf16.msra.mxu1 %v3453_v20 }
 0xa8b   :  { %v2661_v39 = vadd.f32 %v2660_v6, %v2659_v36  ;;  %3455 = vmatprep.subr.bf16.mxu1 %v3605_v28 }
 0xa8d   :  { %v2663_v41 = vadd.f32 %v2662_v40, %v2661_v39 }
 0xa8e   :  { %3457 = vmatpush3.bf16.msra.mxu1 %v3456_v24 }
 0xa8f   :  { %v2664_v42 = vrot.slane %v2663_v41, 4 }
 0xa91   :  { %3344 = vmatmul.mubr.msk.f32.vlgmr.msra.gmra.mrb[50].mxu1 %vm351_vm3, %v3983_v27  ;;  %v2665_v43 = vadd.f32 %v2664_v42, %v2663_v41 }
 0xa93   :  { %v2666_v44 = vrot.slane %v2665_v43, 2 }
 0xa95   :  { %v2667_v45 = vadd.f32 %v2666_v44, %v2665_v43 }
 0xa97   :  { %v2668_v46 = vrot.slane %v2667_v45, 1 }
 0xa99   :  { %v2669_v47 = vadd.f32 %v2668_v46, %v2667_v45 }
 0xa9b   :  { %3603 = vrcp.f32 %v2669_v47 }
 0xaa5   :  { %v3604_v48 = vpop.eup %3603 }
 0xb64   :  { %v2739_v49 = vpop.f32.mrb[50].mxu1 }
 0xb65   :  { %v2744_v50 = vmul.f32 %v3604_v48, %v2739_v49  ;;  %v3345_v51 = vpop.f32.mrb[51].mxu1 }
 0xb67   :  { %2853 = vst.msk [vmem:[%s4089_s2 + $0x38] sm:$0xff] %vm351_vm3, %v2744_v50 }

</bundles_post_ra>
